<compile_context>
chip_gen: v5e
topology: v5e:2x2
jax: 0.10.0
libtpu: 0.0.40
codegen_flags: <defaults>
</compile_context>

<pallas_src>
import functools
import math

import jax
import jax.numpy as jnp
from jax.experimental import pallas as pl
from jax.experimental.pallas import tpu as pltpu


def _round_up(v, m):
    return (v + m - 1) // m * m


# ---------------------------------------------------------------------------
# ChebyshevConv: Pallas kernel + wrapper
# ---------------------------------------------------------------------------
def _cheb_kernel(x_ref, L_ref, w_ref, b_ref, o_ref, slab_ref, *tbf_refs,
                 K, Fin_p, tm, apply_relu, l_resident):
    """Grid step (k, i): produce T_{k+1} rows [i*tm : (i+1)*tm] in the slab;
    on the last k also do the fused weight contraction for that row block."""
    k_id = pl.program_id(0)                  # recursion step -> produces T_{k_id+1}
    i = pl.program_id(1)                     # row-block index
    row0 = pl.multiple_of(i * tm, tm)

    if l_resident:
        Lblk = L_ref[pl.ds(row0, tm), :]     # slice of the VMEM-resident Laplacian
    else:
        Lblk = L_ref[...]                    # streamed (tm, N_p) bf16 row slab

    # --- step 0: deposit T_0 = x and compute T_1 = L @ x ---------------------
    @pl.when(k_id == 0)
    def _():
        slab_ref[pl.ds(row0, tm), pl.ds(0, Fin_p)] = x_ref[pl.ds(row0, tm), :]
        t1 = jnp.dot(Lblk, x_ref[...].astype(jnp.bfloat16),
                     preferred_element_type=jnp.float32)
        slab_ref[pl.ds(row0, tm), pl.ds(Fin_p, Fin_p)] = t1
        if K > 2:                                            # bf16 copy for next dot
            tbf_refs[0][pl.ds(row0, tm), :] = t1.astype(jnp.bfloat16)

    # --- steps k >= 1:  T_{k+1} = 2 * L @ T_k - T_{k-1}  (static unroll) -----
    for kk in range(2, K):
        @pl.when(k_id == kk - 1)
        def _(kk=kk):
            t_prev_bf = tbf_refs[(kk - 2) % 2][...]          # full T_{kk-1}, bf16
            t_new = 2.0 * jnp.dot(Lblk, t_prev_bf,
                                  preferred_element_type=jnp.float32)
            t_new = t_new - slab_ref[pl.ds(row0, tm), pl.ds((kk - 2) * Fin_p, Fin_p)]
            slab_ref[pl.ds(row0, tm), pl.ds(kk * Fin_p, Fin_p)] = t_new
            if kk < K - 1:                                   # only needed by next step
                tbf_refs[(kk - 1) % 2][pl.ds(row0, tm), :] = t_new.astype(jnp.bfloat16)

    # --- last step: ONE fused (tm, K*Fin_p) @ (K*Fin_p, Fout_p) MXU matmul ---
    @pl.when(k_id == K - 2)
    def _():
        rows = slab_ref[pl.ds(row0, tm), :]                  # (tm, K*Fin_p) f32
        acc = jnp.dot(rows.astype(jnp.bfloat16), w_ref[...],
                      preferred_element_type=jnp.float32)
        acc = acc + b_ref[...]                               # (1, Fout_p) broadcast
        if apply_relu:
            acc = jnp.maximum(acc, 0.0)
        o_ref[...] = acc.astype(o_ref.dtype)


def chebyshev_conv(x, L, weight, bias=None, *, apply_relu=False,
                   force_stream=False):
    """Pallas implementation of ChebyshevConv.forward (optionally fusing ReLU).

    x: (N, Fin) f32, L: (N, N) f32 dense Laplacian, weight: (K, Fin, Fout),
    bias: (Fout,) or None.  Returns (N, Fout) f32.
    """
    N, Fin = x.shape
    K, Fin_w, Fout = weight.shape
    if Fin_w != Fin:
        raise ValueError("weight.shape[1] must equal x.shape[1]")
    # TODO(synk): K==0 / K==1 are shape-inconsistent in the original module
    # (len(poly) != weight.shape[0]); only K >= 2 is implemented here.
    if K < 2:
        raise ValueError("ChebyshevConv Pallas kernel supports K >= 2 only")

    Fin_p = _round_up(Fin, 128)            # lane-dense slab columns
    Fout_p = _round_up(Fout, 128)          # lane-dense output stores

    # Row-tile size: multiple of 8; shrink for huge graphs so the streamed
    # double-buffered (tm, N_p) bf16 L slices stay <= ~12 MiB.
    tm = 256 if N > 1024 else 128
    N_align = _round_up(N, 128)
    while tm > 8 and 4 * tm * N_align > (12 << 20):
        tm //= 2
    N_p = _round_up(N, tm if tm >= 128 else 128)   # multiple of tm AND 128

    # --- VMEM budgeting / L residency decision -------------------------------
    slab_bytes = N_p * K * Fin_p * 4
    tbf_bytes = (2 * N_p * Fin_p * 2) if K > 2 else 0
    l_full_bytes = N_p * N_p * 2
    common = (2 * N_p * Fin_p * 4            # x (f32, constant block, 2 bufs)
              + 2 * K * Fin_p * Fout_p * 2   # fused weight (bf16)
              + 2 * Fout_p * 4               # bias
              + 2 * tm * Fout_p * 4          # out tile
              + slab_bytes + tbf_bytes)      # persistent scratch
    budget = 40 << 20                        # conservative (v7x: 64 MiB physical)
    l_resident = (not force_stream) and (common + 2 * l_full_bytes <= budget)

    # Zero-padding is exact: padded L rows/cols and x rows are zero, so padded
    # T_k rows/cols stay zero and contribute nothing to the real outputs.
    x_p = jnp.zeros((N_p, Fin_p), jnp.float32).at[:N, :Fin].set(x.astype(jnp.float32))
    L_p = (jnp.zeros((N_p, N_p), jnp.float32).at[:N, :N].set(L.astype(jnp.float32))
           .astype(jnp.bfloat16))
    w_p = jnp.zeros((K, Fin_p, Fout_p), jnp.float32).at[:, :Fin, :Fout].set(
        weight.astype(jnp.float32))
    w_p = w_p.reshape(K * Fin_p, Fout_p).astype(jnp.bfloat16)   # fused-contraction layout
    b_p = jnp.zeros((1, Fout_p), jnp.float32)
    if bias is not None:
        b_p = b_p.at[0, :Fout].set(bias.astype(jnp.float32))

    n_blocks = N_p // tm
    grid = (K - 1, n_blocks)

    kernel = functools.partial(_cheb_kernel, K=K, Fin_p=Fin_p, tm=tm,
                               apply_relu=apply_relu, l_resident=l_resident)

    if l_resident:
        l_spec = pl.BlockSpec((N_p, N_p), lambda k, i: (0, 0))    # DMA'd once
        l_hbm_bytes = l_full_bytes
        l_vmem = 2 * l_full_bytes
    else:
        l_spec = pl.BlockSpec((tm, N_p), lambda k, i: (i, 0))     # streamed per sweep
        l_hbm_bytes = (K - 1) * l_full_bytes
        l_vmem = 2 * tm * N_p * 2

    # Advisory cost estimate so XLA can schedule the custom call sensibly.
    flops = 2.0 * (K - 1) * N_p * N_p * Fin_p + 2.0 * N_p * (K * Fin_p) * Fout_p
    bytes_accessed = (l_hbm_bytes
                      + x_p.size * 4 + w_p.size * 2 + b_p.size * 4
                      + (K - 1) * N_p * Fout_p * 4)
    cost = pl.CostEstimate(flops=int(flops), transcendentals=0,
                           bytes_accessed=int(bytes_accessed))

    vmem_est = common + l_vmem
    vmem_limit = min(max(int(vmem_est * 1.25) + (4 << 20), 32 << 20), 64 << 20)

    scratch = [pltpu.VMEM((N_p, K * Fin_p), jnp.float32)]         # T_k slab (f32)
    if K > 2:
        scratch += [pltpu.VMEM((N_p, Fin_p), jnp.bfloat16),       # bf16 ping-pong
                    pltpu.VMEM((N_p, Fin_p), jnp.bfloat16)]

    out_p = pl.pallas_call(
        kernel,
        grid=grid,
        in_specs=[
            pl.BlockSpec((N_p, Fin_p), lambda k, i: (0, 0)),         # x (constant block)
            l_spec,                                                  # L (resident/streamed)
            pl.BlockSpec((K * Fin_p, Fout_p), lambda k, i: (0, 0)),  # fused weight
            pl.BlockSpec((1, Fout_p), lambda k, i: (0, 0)),          # bias
        ],
        out_specs=pl.BlockSpec((tm, Fout_p), lambda k, i: (i, 0)),
        out_shape=jax.ShapeDtypeStruct((N_p, Fout_p), jnp.float32),
        scratch_shapes=scratch,
        compiler_params=pltpu.CompilerParams(
            # Both axes carry dependencies through the slab scratch (every row
            # block of T_{k+1} reads the FULL T_k), so neither may be sharded
            # across v7x's two TensorCores for a single graph.
            dimension_semantics=("arbitrary", "arbitrary"),
            vmem_limit_bytes=vmem_limit,
        ),
        cost_estimate=cost,
    )(x_p, L_p, w_p, b_p)

    return out_p[:N, :Fout]


# ---------------------------------------------------------------------------
# nn.Linear: small single-block Pallas kernel (lane-dense padded)
# ---------------------------------------------------------------------------
def _linear_kernel(x_ref, w_ref, b_ref, o_ref):
    acc = jnp.dot(x_ref[...].astype(jnp.bfloat16), w_ref[...],
                  preferred_element_type=jnp.float32)
    o_ref[...] = (acc + b_ref[...]).astype(o_ref.dtype)


def linear(x, weight, bias=None):
    """y = x @ W (+ b).  weight: (Fin, Fout)."""
    # TODO(synk): row-tile for very large N; the GCN hidden dims here are tiny.
    N, Fin = x.shape
    _, Fout = weight.shape
    N_p = _round_up(N, 8)
    Fin_p = _round_up(Fin, 128)
    Fout_p = _round_up(Fout, 128)

    x_p = jnp.zeros((N_p, Fin_p), jnp.float32).at[:N, :Fin].set(x.astype(jnp.float32))
    w_p = (jnp.zeros((Fin_p, Fout_p), jnp.float32).at[:Fin, :Fout]
           .set(weight.astype(jnp.float32)).astype(jnp.bfloat16))
    b_p = jnp.zeros((1, Fout_p), jnp.float32)
    if bias is not None:
        b_p = b_p.at[0, :Fout].set(bias.astype(jnp.float32))

    out_p = pl.pallas_call(
        _linear_kernel,
        grid=(1,),
        in_specs=[pl.BlockSpec((N_p, Fin_p), lambda i: (0, 0)),
                  pl.BlockSpec((Fin_p, Fout_p), lambda i: (0, 0)),
                  pl.BlockSpec((1, Fout_p), lambda i: (0, 0))],
        out_specs=pl.BlockSpec((N_p, Fout_p), lambda i: (0, 0)),
        out_shape=jax.ShapeDtypeStruct((N_p, Fout_p), jnp.float32),
        compiler_params=pltpu.CompilerParams(dimension_semantics=("arbitrary",)),
    )(x_p, w_p, b_p)
    return out_p[:N, :Fout]


# ---------------------------------------------------------------------------
# ChebGCN: parameter construction + forward (composes the Pallas kernels)
# ---------------------------------------------------------------------------
def init_cheb_gcn(key, size_in, size_out, hidden_dim, nb_layers, K, enable_bias=True):
    """Mirrors ChebGCN.__init__ layer layout (init scale chosen for O(1) activations)."""
    def lin_p(k, fi, fo, use_b):
        kw, kb = jax.random.split(k)
        b = math.sqrt(3.0) / math.sqrt(fi)
        w = jax.random.uniform(kw, (fi, fo), jnp.float32, -b, b)
        bias = jax.random.uniform(kb, (fo,), jnp.float32, -b, b) if use_b else None
        return w, bias

    def cheb_p(k, fi, fo, use_b):
        kw, kb = jax.random.split(k)
        b = math.sqrt(6.0) / math.sqrt(K * fi)
        w = jax.random.uniform(kw, (K, fi, fo), jnp.float32, -b, b)
        bias = jax.random.uniform(kb, (fo,), jnp.float32, -b, b) if use_b else None
        return w, bias

    layers = []
    h = hidden_dim
    if size_in != hidden_dim:
        key, sub = jax.random.split(key)
        layers.append(("linear",) + lin_p(sub, size_in, hidden_dim, enable_bias))
    for _ in range(nb_layers):
        new = int(h / 2)
        key, sub = jax.random.split(key)
        # NOTE: the original ChebyshevConv tests `bias != None`, so it always
        # owns a bias when ChebGCN passes a bool; we run with enable_bias=True.
        layers.append(("cheb",) + cheb_p(sub, h, new, enable_bias))
        h = new
    for _ in range(nb_layers):
        new = int(h * 2)
        key, sub = jax.random.split(key)
        layers.append(("cheb",) + cheb_p(sub, h, new, enable_bias))
        h = new
    if size_in != h:
        key, sub = jax.random.split(key)
        layers.append(("linear",) + lin_p(sub, h, size_out, enable_bias))
    return layers


def cheb_gcn_forward(layers, x, L):
    for kind, w, b in layers:
        if kind == "linear":
            x = linear(x, w, b)
        else:
            # ReLU is fused into the ChebyshevConv kernel; dropout is None in
            # this configuration (inference-mode identity).
            x = chebyshev_conv(x, L, w, b, apply_relu=True)
    return x


# ---------------------------------------------------------------------------
# References
# ---------------------------------------------------------------------------
def _cheb_ref_f32(x, L, w, b):
    """Pure-f32 reference mirroring the PyTorch forward exactly."""
    K = w.shape[0]
    poly = [x, L @ x]
    for k in range(2, K):
        poly.append(2.0 * (L @ poly[k - 1]) - poly[k - 2])
    feat = jnp.stack(poly, axis=0)
    out = jnp.einsum("bij,bjk->ik", feat, w)
    return out + b if b is not None else out


def _cheb_ref_bf16(x, L, w, b):
    """Reference with the same bf16-operand / f32-accumulate casts as the kernel."""
    K, Fin, Fout = w.shape
    Lb = L.astype(jnp.bfloat16)
    T = [x.astype(jnp.float32)]
    T.append(jnp.dot(Lb, T[0].astype(jnp.bfloat16), preferred_element_type=jnp.float32))
    for k in range(2, K):
        T.append(2.0 * jnp.dot(Lb, T[k - 1].astype(jnp.bfloat16),
                               preferred_element_type=jnp.float32) - T[k - 2])
    slab = jnp.concatenate(T, axis=1)
    out = jnp.dot(slab.astype(jnp.bfloat16),
                  w.reshape(K * Fin, Fout).astype(jnp.bfloat16),
                  preferred_element_type=jnp.float32)
    return out + b if b is not None else out


def _gcn_ref(layers, x, L, cheb_fn, linear_bf16):
    for kind, w, b in layers:
        if kind == "linear":
            if linear_bf16:
                y = jnp.dot(x.astype(jnp.bfloat16), w.astype(jnp.bfloat16),
                            preferred_element_type=jnp.float32)
            else:
                y = x @ w
            x = y + b if b is not None else y
        else:
            x = jnp.maximum(cheb_fn(x, L, w, b), 0.0)
    return x


# ---------------------------------------------------------------------------
if __name__ == "__main__":
    key = jax.random.PRNGKey(0)

    # Small but non-trivial shapes: N is not a multiple of 8/128 (exercises
    # padding) and N_p > tm so multiple row blocks are exercised.
    N, size_in, size_out, hidden, nb_layers, K = 200, 48, 48, 32, 1, 3

    key, kx, kA = jax.random.split(key, 3)
    x = jax.random.normal(kx, (N, size_in), dtype=jnp.float32)
    A = jax.random.normal(kA, (N, N), dtype=jnp.float32)
    L = (A + A.T) / (2.0 * math.sqrt(N))        # symmetric, O(1) spectral scale

    # --- standalone ChebyshevConv check (both L-resident and streamed paths) --
    key, kw, kb, kxc = jax.random.split(key, 4)
    Fin_c, Fout_c = 32, 48
    xc = jax.random.normal(kxc, (N, Fin_c), dtype=jnp.float32)
    bound = math.sqrt(6.0) / math.sqrt(K * Fin_c)
    wc = jax.random.uniform(kw, (K, Fin_c, Fout_c), jnp.float32, -bound, bound)
    bc = jax.random.uniform(kb, (Fout_c,), jnp.float32, -bound, bound)

    ref_bf16 = _cheb_ref_bf16(xc, L, wc, bc)
    ref_f32 = _cheb_ref_f32(xc, L, wc, bc)
    for stream in (False, True):
        out_c = jax.block_until_ready(
            chebyshev_conv(xc, L, wc, bc, force_stream=stream))
        assert out_c.shape == (N, Fout_c)
        assert jnp.allclose(out_c, ref_bf16, atol=5e-3, rtol=5e-3), \
            f"ChebyshevConv mismatch vs bf16-matched reference (stream={stream})"
        assert jnp.allclose(out_c, ref_f32, atol=3e-2, rtol=3e-2), \
            f"ChebyshevConv mismatch vs f32 reference (stream={stream})"

    # --- full ChebGCN forward ------------------------------------------------
    key, kinit = jax.random.split(key)
    layers = init_cheb_gcn(kinit, size_in, size_out, hidden, nb_layers, K,
                           enable_bias=True)
    out = jax.block_until_ready(cheb_gcn_forward(layers, x, L))
    assert out.shape == (N, size_out)
    assert jnp.allclose(out, _gcn_ref(layers, x, L, _cheb_ref_bf16, True),
                        atol=5e-3, rtol=5e-3), "ChebGCN mismatch vs bf16-matched reference"
    assert jnp.allclose(out, _gcn_ref(layers, x, L, _cheb_ref_f32, False),
                        atol=5e-2, rtol=5e-2), "ChebGCN mismatch vs f32 reference"

    print("KERNEL_OK")
</pallas_src>

<mosaic_0001>
module attributes {stable_mosaic.version = 11 : i64} {
  func.func @_cheb_kernel(%arg0: i32, %arg1: i32, %arg2: memref<256x128xf32, #tpu.memory_space<vmem>>, %arg3: memref<256x256xbf16, #tpu.memory_space<vmem>>, %arg4: memref<384x128xbf16, #tpu.memory_space<vmem>>, %arg5: memref<1x128xf32, #tpu.memory_space<vmem>>, %arg6: memref<128x128xf32, #tpu.memory_space<vmem>>, %arg7: memref<256x384xf32, #tpu.memory_space<vmem>>, %arg8: memref<256x128xbf16, #tpu.memory_space<vmem>>, %arg9: memref<256x128xbf16, #tpu.memory_space<vmem>>) attributes {dimension_semantics = [#tpu.dimension_semantics<arbitrary>, #tpu.dimension_semantics<arbitrary>], iteration_bounds = array<i64: 2, 2>, scalar_prefetch = 0 : i64, scratch_operands = 3 : i64, tpu.core_type = #tpu.core_type<tc>, window_params = [{pipeline_mode = #tpu.pipeline_mode<synchronous>, transform_indices = @transform_0, window_bounds = array<i64: 256, 128>}, {pipeline_mode = #tpu.pipeline_mode<synchronous>, transform_indices = @transform_1, window_bounds = array<i64: 256, 256>}, {pipeline_mode = #tpu.pipeline_mode<synchronous>, transform_indices = @transform_2, window_bounds = array<i64: 384, 128>}, {pipeline_mode = #tpu.pipeline_mode<synchronous>, transform_indices = @transform_3, window_bounds = array<i64: 1, 128>}, {transform_indices = @transform_4, window_bounds = array<i64: 128, 128>}]} {
    %c128_i32 = arith.constant 128 : i32
    %0 = arith.muli %arg1, %c128_i32 : i32
    %1 = tpu.assume_multiple %0, 128 : i32
    %2 = arith.index_cast %1 : i32 to index
    %c0 = arith.constant 0 : index
    %3 = vector.load %arg3[%2, %c0] : memref<256x256xbf16, #tpu.memory_space<vmem>>, vector<128x256xbf16>
    %c0_i32 = arith.constant 0 : i32
    %4 = arith.cmpi eq, %arg0, %c0_i32 : i32
    %5 = arith.extui %4 : i1 to i32
    %c0_i32_0 = arith.constant 0 : i32
    %6 = arith.cmpi ne, %5, %c0_i32_0 : i32
    scf.if %6 {
      %13 = arith.index_cast %1 : i32 to index
      %c0_4 = arith.constant 0 : index
      %14 = vector.load %arg2[%13, %c0_4] : memref<256x128xf32, #tpu.memory_space<vmem>>, vector<128x128xf32>
      %15 = arith.index_cast %1 : i32 to index
      %c0_5 = arith.constant 0 : index
      %16 = vector.load %arg7[%15, %c0_5] : memref<256x384xf32, #tpu.memory_space<vmem>>, vector<128x128xf32>
      tpu.vector_store %arg7[%15, %c0_5], %14 {strides = array<i32>} : memref<256x384xf32, #tpu.memory_space<vmem>>, vector<128x128xf32>,
      %c0_6 = arith.constant 0 : index
      %c0_7 = arith.constant 0 : index
      %17 = vector.load %arg2[%c0_6, %c0_7] : memref<256x128xf32, #tpu.memory_space<vmem>>, vector<256x128xf32>
      %18 = arith.truncf %17 : vector<256x128xf32> to vector<256x128xbf16>
      %cst = arith.constant dense<0.000000e+00> : vector<128x128xf32>
      %19 = tpu.matmul %3, %18, %cst {dimension_numbers = #tpu.dot_dimension_numbers<[1], [0], [0], [1], [0, 0, 1, 1], [], []>} : vector<128x256xbf16>, vector<256x128xbf16>, vector<128x128xf32> -> vector<128x128xf32>
      %20 = arith.index_cast %1 : i32 to index
      %c128 = arith.constant 128 : index
      %21 = vector.load %arg7[%20, %c128] : memref<256x384xf32, #tpu.memory_space<vmem>>, vector<128x128xf32>
      tpu.vector_store %arg7[%20, %c128], %19 {strides = array<i32>} : memref<256x384xf32, #tpu.memory_space<vmem>>, vector<128x128xf32>,
      %22 = arith.truncf %19 : vector<128x128xf32> to vector<128x128xbf16>
      %23 = arith.index_cast %1 : i32 to index
      %c0_8 = arith.constant 0 : index
      %24 = vector.load %arg8[%23, %c0_8] : memref<256x128xbf16, #tpu.memory_space<vmem>>, vector<128x128xbf16>
      tpu.vector_store %arg8[%23, %c0_8], %22 {strides = array<i32>} : memref<256x128xbf16, #tpu.memory_space<vmem>>, vector<128x128xbf16>,
    } else {
    }
    %c1_i32 = arith.constant 1 : i32
    %7 = arith.cmpi eq, %arg0, %c1_i32 : i32
    %8 = arith.extui %7 : i1 to i32
    %c0_i32_1 = arith.constant 0 : i32
    %9 = arith.cmpi ne, %8, %c0_i32_1 : i32
    scf.if %9 {
      %c0_4 = arith.constant 0 : index
      %c0_5 = arith.constant 0 : index
      %13 = vector.load %arg8[%c0_4, %c0_5] : memref<256x128xbf16, #tpu.memory_space<vmem>>, vector<256x128xbf16>
      %cst = arith.constant dense<0.000000e+00> : vector<128x128xf32>
      %14 = tpu.matmul %3, %13, %cst {dimension_numbers = #tpu.dot_dimension_numbers<[1], [0], [0], [1], [0, 0, 1, 1], [], []>} : vector<128x256xbf16>, vector<256x128xbf16>, vector<128x128xf32> -> vector<128x128xf32>
      %cst_6 = arith.constant 2.000000e+00 : f32
      %15 = vector.broadcast %cst_6 : f32 to vector<128x128xf32>
      %16 = arith.mulf %15, %14 : vector<128x128xf32>
      %17 = arith.index_cast %1 : i32 to index
      %c0_7 = arith.constant 0 : index
      %18 = vector.load %arg7[%17, %c0_7] : memref<256x384xf32, #tpu.memory_space<vmem>>, vector<128x128xf32>
      %19 = arith.subf %16, %18 : vector<128x128xf32>
      %20 = arith.index_cast %1 : i32 to index
      %c256 = arith.constant 256 : index
      %21 = vector.load %arg7[%20, %c256] : memref<256x384xf32, #tpu.memory_space<vmem>>, vector<128x128xf32>
      tpu.vector_store %arg7[%20, %c256], %19 {strides = array<i32>} : memref<256x384xf32, #tpu.memory_space<vmem>>, vector<128x128xf32>,
    } else {
    }
    %c1_i32_2 = arith.constant 1 : i32
    %10 = arith.cmpi eq, %arg0, %c1_i32_2 : i32
    %11 = arith.extui %10 : i1 to i32
    %c0_i32_3 = arith.constant 0 : i32
    %12 = arith.cmpi ne, %11, %c0_i32_3 : i32
    scf.if %12 {
      %13 = arith.index_cast %1 : i32 to index
      %c0_4 = arith.constant 0 : index
      %14 = vector.load %arg7[%13, %c0_4] : memref<256x384xf32, #tpu.memory_space<vmem>>, vector<128x384xf32>
      %15 = arith.truncf %14 : vector<128x384xf32> to vector<128x384xbf16>
      %c0_5 = arith.constant 0 : index
      %c0_6 = arith.constant 0 : index
      %16 = vector.load %arg4[%c0_5, %c0_6] : memref<384x128xbf16, #tpu.memory_space<vmem>>, vector<384x128xbf16>
      %cst = arith.constant dense<0.000000e+00> : vector<128x128xf32>
      %17 = tpu.matmul %15, %16, %cst {dimension_numbers = #tpu.dot_dimension_numbers<[1], [0], [0], [1], [0, 0, 1, 1], [], []>} : vector<128x384xbf16>, vector<384x128xbf16>, vector<128x128xf32> -> vector<128x128xf32>
      %c0_7 = arith.constant 0 : index
      %c0_8 = arith.constant 0 : index
      %18 = vector.load %arg5[%c0_7, %c0_8] : memref<1x128xf32, #tpu.memory_space<vmem>>, vector<1x128xf32>
      %19 = vector.broadcast %18 : vector<1x128xf32> to vector<128x128xf32>
      %20 = arith.addf %17, %19 : vector<128x128xf32>
      %c0_9 = arith.constant 0 : index
      %c0_10 = arith.constant 0 : index
      %21 = vector.load %arg6[%c0_9, %c0_10] : memref<128x128xf32, #tpu.memory_space<vmem>>, vector<128x128xf32>
      tpu.vector_store %arg6[%c0_9, %c0_10], %20 {strides = array<i32>} : memref<128x128xf32, #tpu.memory_space<vmem>>, vector<128x128xf32>,
    } else {
    }
    return
  }
  func.func @transform_0(%arg0: i32, %arg1: i32) -> (i32, i32) {
    %c0_i32 = arith.constant 0 : i32
    %c0_i32_0 = arith.constant 0 : i32
    %c0_i32_1 = arith.constant 0 : i32
    return %c0_i32, %c0_i32_0 : i32, i32
  }
  func.func @transform_1(%arg0: i32, %arg1: i32) -> (i32, i32) {
    %c0_i32 = arith.constant 0 : i32
    %c0_i32_0 = arith.constant 0 : i32
    %c0_i32_1 = arith.constant 0 : i32
    return %c0_i32, %c0_i32_0 : i32, i32
  }
  func.func @transform_2(%arg0: i32, %arg1: i32) -> (i32, i32) {
    %c0_i32 = arith.constant 0 : i32
    %c0_i32_0 = arith.constant 0 : i32
    %c0_i32_1 = arith.constant 0 : i32
    return %c0_i32, %c0_i32_0 : i32, i32
  }
  func.func @transform_3(%arg0: i32, %arg1: i32) -> (i32, i32) {
    %c0_i32 = arith.constant 0 : i32
    %c0_i32_0 = arith.constant 0 : i32
    %c0_i32_1 = arith.constant 0 : i32
    return %c0_i32, %c0_i32_0 : i32, i32
  }
  func.func @transform_4(%arg0: i32, %arg1: i32) -> (i32, i32) {
    %c0_i32 = arith.constant 0 : i32
    %c0_i32_0 = arith.constant 0 : i32
    return %arg1, %c0_i32 : i32, i32
  }
}

</mosaic_0001>

<bundles_post_ra>
// kernel: tpu_custom_call.1
= control target key start
LH: loop header
LB: loop body
LE: loop exit
PB: predicated region body
PF: predicated region fallthrough
CT: control target
= control target key end

     0   :  { %s2896_s0 = inlined_call_operand.hbm [shape: f32[256,128], index: 0, kind: input, shape index: {}]   ;;  %s2897_s1 = inlined_call_operand.hbm [shape: bf16[256,256], index: 1, kind: input, shape index: {}]   ;;  %s2898_s2 = inlined_call_operand.hbm [shape: bf16[384,128], index: 2, kind: input, shape index: {}]   ;;  %s2899_s3 = inlined_call_operand.vmem [shape: f32[1,128], index: 3, kind: input, shape index: {}]   ;;  %s2900_s4 = inlined_call_operand.hbm [shape: f32[256,128], index: 4, kind: output, shape index: {}]  }
   0x1   :  { %2904 = sst [smem:[#allocation37_spill]] %s2897_s1 }
   0x2   :  { %9 = vsyncpa [#allocation6], 0 }
   0x3   :  { %10 = vsyncpa [#allocation9], 0 }
   0x4   :  { %11 = vsyncpa [#allocation7], 0 }
   0x5   :  { %13 = vsyncpa [#allocation7 + $0x1], 0  ;;  %s2315_s15 = smov 0   ;;  %s2317_s16 = smov 0  }
   0x6   :  { %s2319_s17 = smov 0   ;;  %s2321_s18 = smov 0  }
   0x7   :  { %s2323_s19 = smov 0   ;;  %s2325_s20 = smov 0  }
   0x8   :  { %s2327_s21 = smov 0   ;;  %s2329_s22 = smov 0  }
   0x9 LB: > { %2905 = sst [smem:[#allocation15_spill]] %s2271_s20  ;;  %s1503_s23 = sadd.s32 4294967295, %s2279_s22   ;;  %s2279_s22 = sphi %s2329_s22, %s19_s22   ;;  %s2275_s21 = sphi %s2327_s21, %s2954_s21   ;;  %s2271_s20 = sphi %s2325_s20, %s2953_s20   ;;  %s2267_s19 = sphi %s2323_s19, %s2952_s19   ;;  %s2263_s18 = sphi %s2321_s18, %s2951_s18   ;;  %s2259_s17 = sphi %s2319_s17, %s2957_s17   ;;  %s2255_s16 = sphi %s2317_s16, %s2956_s16   ;;  %s2251_s15 = sphi %s2315_s15, %s2955_s15  }
   0xa   : > { %2906 = sst [smem:[#allocation16_spill]] %s2275_s21  ;;  %s1504_s24 = sadd.s32 4294967294, %s2279_s22  }
   0xb   : > { %s28_s25 = sadd.s32 1, %s2271_s20  ;;  %s31_s26 = sadd.s32 1, %s2275_s21 }
   0xc   : > { %p29_p0 = scmp.ge.s32.totalorder %s28_s25, 2  ;;  %s122_s27 = sadd.s32 1, %s2259_s17 }
   0xd   : > { %p132_p1 = scmp.ne.s32.totalorder %s2259_s17, %s2255_s16  ;;  %p133_p2 = scmp.eq.s32.totalorder %s1503_s23, 3 }
   0xe   : > { %s2959_s25 = smov (%p29_p0, %s28_s25), 0  ;;  %s2961_s26 = smov (!%p29_p0, %s31_s26), %s2275_s21 }
   0xf   : > { %2907 = sst [smem:[#allocation17_spill]] %s2959_s25  ;;  %s119_s28 = ssub.s32 %s2271_s20, %s2959_s25 }
  0x10   : > { %p2367_p3 = por %p133_p2, %p132_p1  ;;  %p33_p4 = scmp.ge.s32.totalorder %s2961_s26, 2 }
  0x11   : > { %p120_p5 = scmp.eq.s32.totalorder %s119_s28, 0  ;;  %p138_p6 = scmp.ne.s32.totalorder %s2255_s16, %s2251_s15 }
  0x12   : > { %p139_p7 = scmp.eq.s32.totalorder %s1504_s24, 3  ;;  %s2963_s26 = smov (%p33_p4, %s2961_s26), 0 }
  0x13   : > { %2909 = sst [smem:[#allocation18_spill]] %s2963_s26  ;;  %p1505_p9 = scmp.ge.s32.totalorder %s2279_s22, 1 }
  0x14   : > { %s2376_s30 = scalar_select %p120_p5, %s2259_s17, %s122_s27  }
  0x15   : > { %p2378_p8 = por %p139_p7, %p138_p6  ;;  %p146_p10 = scmp.lt.s32.totalorder %s2279_s22, 5 }
  0x16   : > { %p2384_p11 = scmp.eq.s32.totalorder %s1503_s23, 0  ;;  %s2913_s1 = sld [smem:[#allocation37_spill]] }
  0x17   : > { %p2388_p12 = pnand %p1505_p9, %p146_p10  ;;  %s2281_s11 = smov [#allocation8]  }
  0x18   : > { %s173_s12 = sshll.u32 %s2281_s11, 4  ;;  %s2282_s14 = smov 128   ;;  %s174_s12 = int_to_ptr.vmem [resolvable:$true] %s173_s12 }
  0x19   : > { %p1992_p13 = pneg %p2388_p12  ;;  %s2283_s23 = smov 8  }
  0x1a   : > { %s157_s28 = sshll.u32 %s2896_s0, 4  ;;  %s2284_s8 = smov [#allocation5]   ;;  %s158_s28 = int_to_ptr.hbm [resolvable:$true] %s157_s28 }
  0x1b   : > { %p2399_p0 = pnand %p2384_p11, %p1992_p13  ;;  %s159_s9 = sshll.u32 %s2284_s8, 4  ;;  %s160_s9 = int_to_ptr.vmem [resolvable:$true] %s159_s9 }
  0x1c   : > { %s171_s10 = sshll.u32 %s2913_s1, 4  ;;  %s185_s26 = sshll.u32 %s2898_s2, 4  ;;  %s172_s10 = int_to_ptr.hbm [resolvable:$true] %s171_s10  ;;  %s186_s26 = int_to_ptr.hbm [resolvable:$true] %s185_s26 }
  0x1d   : > { %1998 = dma.hbm_to_vmem [thread:$0]  (!%p2399_p0), %s172_s10, 4096, %s174_s12, [#allocation9], %s2282_s14, %s2282_s14, %s2283_s23  }
  0x1e   : > { %1995 = dma.hbm_to_vmem [thread:$0]  (!%p2399_p0), %s158_s28, 4096, %s160_s9, [#allocation6], %s2282_s14, %s2282_s14, %s2283_s23  }
  0x1f   : > { %s2285_s25 = smov [#allocation10]   ;;  %s2286_s20 = smov 64  }
  0x20   : > { %s187_s21 = sshll.u32 %s2285_s25, 4  ;;  %s2287_s10 = smov 4   ;;  %s188_s21 = int_to_ptr.vmem [resolvable:$true] %s187_s21 }
  0x21   : > { %2001 = dma.hbm_to_vmem [thread:$0]  (!%p2399_p0), %s186_s26, 3072, %s188_s21, [#allocation9], %s2286_s20, %s2286_s20, %s2287_s10  }
  0x22   : > { %206 = sbr.rel (%p2388_p12) target bundleno = 778 (0x30a), region = 36 }
  0x27   : > { %2238 = dma.done.wait (%p2384_p11), [#allocation6], 4096  }
  0x28   : > { %2240 = vsyncadd (%p2384_p11), [#allocation6], 4294963200 }
  0x29   : > { %2242 = dma.done.wait (%p2384_p11), [#allocation9], 7168  }
  0x2a   : > { %2244 = vsyncadd (%p2384_p11), [#allocation9], 4294960128  ;;  %s235_s1 = sand.u32 1, %s2255_s16   ;;  %s2427_s20 = sshll.u32 %s2263_s18, 7 }
  0x2b   : > { %s2431_s21 = sshll.u32 %s235_s1, 7  ;;  %s2434_s25 = sshra.s32 %s2427_s20, 3 }
  0x2c   : > { %s2437_s26 = scalar_lea.vmem [#allocation8], %s2427_s20  ;;  %s2632_s18 = scalar_lea.vmem [#allocation11], %s2431_s21 }
  0x2d   : > { %v2440_v0 = vld [vmem:[%s2437_s26 + $0x4] sm:$0xf]  ;;  %v2443_v1 = vld [vmem:[%s2437_s26] sm:$0xf]  ;;  %v2452_v4 = vld [vmem:[%s2437_s26 + $0x8] sm:$0xf0] }
  0x2e   : > { %v2446_v2 = vld [vmem:[%s2437_s26 + $0x4] sm:$0xf]  ;;  %v2449_v3 = vld [vmem:[%s2437_s26] sm:$0xf]  ;;  %v2455_v5 = vld [vmem:[%s2437_s26 + $0x4] sm:$0xf0] }
  0x2f   : > { %v2458_v6 = vld [vmem:[%s2437_s26 + $0x8] sm:$0xf0]  ;;  %v2461_v7 = vld [vmem:[%s2437_s26 + $0x4] sm:$0xf0]  ;;  %v2464_v8 = vld [vmem:[%s2437_s26 + $0x14] sm:$0xf] }
  0x30   : > { %v2467_v9 = vld [vmem:[%s2437_s26 + $0x10] sm:$0xf]  ;;  %v2470_v10 = vld [vmem:[%s2437_s26 + $0x14] sm:$0xf]  ;;  %v2476_v12 = vld [vmem:[%s2437_s26 + $0x18] sm:$0xf0] }
  0x31   : > { %v2473_v11 = vld [vmem:[%s2437_s26 + $0x10] sm:$0xf]  ;;  %v2479_v13 = vld [vmem:[%s2437_s26 + $0x14] sm:$0xf0]  ;;  %v2482_v14 = vld [vmem:[%s2437_s26 + $0x18] sm:$0xf0] }
  0x32   : > { %v2485_v15 = vld [vmem:[%s2437_s26 + $0x14] sm:$0xf0]  ;;  %v2488_v16 = vld [vmem:[%s2437_s26 + $0x24] sm:$0xf]  ;;  %v2491_v17 = vld [vmem:[%s2437_s26 + $0x20] sm:$0xf] }
  0x33   : > { %2915 = vst [vmem:[#allocation19_spill] sm:$0xff] %v2488_v16  ;;  %v2494_v18 = vld [vmem:[%s2437_s26 + $0x24] sm:$0xf]  ;;  %v2497_v19 = vld [vmem:[%s2437_s26 + $0x20] sm:$0xf]  ;;  %p1517_p1 = scmp.ne.s32.totalorder %s2267_s19, 0 }
  0x34   : > { %v2500_v20 = vld [vmem:[%s2437_s26 + $0x28] sm:$0xf0]  ;;  %v2503_v21 = vld [vmem:[%s2437_s26 + $0x24] sm:$0xf0]  ;;  %v2512_v24 = vld [vmem:[%s2437_s26 + $0x34] sm:$0xf] }
  0x35   : > { %2916 = vst [vmem:[#allocation20_spill] sm:$0xff] %v2500_v20  ;;  %v2506_v22 = vld [vmem:[%s2437_s26 + $0x28] sm:$0xf0]  ;;  %v2509_v23 = vld [vmem:[%s2437_s26 + $0x24] sm:$0xf0]  ;;  %s1848_s6 = smul.u32 (!%p1517_p1), 24, %s2434_s25 }
  0x36   : > { %2917 = vst [vmem:[#allocation21_spill] sm:$0xff] %v2512_v24  ;;  %v2515_v25 = vld [vmem:[%s2437_s26 + $0x30] sm:$0xf]  ;;  %v2518_v26 = vld [vmem:[%s2437_s26 + $0x34] sm:$0xf]  ;;  %s265_s7 = scalar_lea.vmem (!%p1517_p1), [#allocation5], %s2427_s20 }
  0x37   : > { %v2521_v27 = vld [vmem:[%s2437_s26 + $0x30] sm:$0xf]  ;;  %v2524_v28 = vld [vmem:[%s2437_s26 + $0x38] sm:$0xf0]  ;;  %v2527_v29 = vld [vmem:[%s2437_s26 + $0x34] sm:$0xf0] }
  0x38   : > { %2918 = vst [vmem:[#allocation22_spill] sm:$0xff] %v2524_v28  ;;  %v2530_v30 = vld [vmem:[%s2437_s26 + $0x38] sm:$0xf0]  ;;  %v2533_v31 = vld [vmem:[%s2437_s26 + $0x34] sm:$0xf0]  ;;  %s2669_s12 = scalar_lea.vmem (!%p1517_p1), [#allocation2], %s1848_s6 }
  0x39   : > { %v2536_v32 = vld [vmem:[%s2437_s26 + $0x44] sm:$0xf]  ;;  %v2539_v33 = vld [vmem:[%s2437_s26 + $0x40] sm:$0xf]  ;;  %v2548_v36 = vld [vmem:[%s2437_s26 + $0x48] sm:$0xf0] }
  0x3a   : > { %2919 = vst [vmem:[#allocation23_spill] sm:$0xff] %v2536_v32  ;;  %v2542_v34 = vld [vmem:[%s2437_s26 + $0x44] sm:$0xf]  ;;  %v2545_v35 = vld [vmem:[%s2437_s26 + $0x40] sm:$0xf]  ;;  %s1583_s13 = sshll.u32 (!%p1517_p1), %s2434_s25, 2 }
  0x3b   : > { %2920 = vst [vmem:[#allocation24_spill] sm:$0xff] %v2548_v36  ;;  %v2551_v37 = vld [vmem:[%s2437_s26 + $0x44] sm:$0xf0]  ;;  %v2554_v38 = vld [vmem:[%s2437_s26 + $0x48] sm:$0xf0]  ;;  %s2691_s14 = scalar_lea.vmem (!%p1517_p1), [#allocation3], %s1583_s13 }
  0x3c   : > { %v2557_v39 = vld [vmem:[%s2437_s26 + $0x44] sm:$0xf0]  ;;  %v2560_v40 = vld [vmem:[%s2437_s26 + $0x54] sm:$0xf]  ;;  %v2563_v41 = vld [vmem:[%s2437_s26 + $0x50] sm:$0xf] }
  0x3d   : > { %2921 = vst [vmem:[#allocation25_spill] sm:$0xff] %v2560_v40  ;;  %v2566_v42 = vld [vmem:[%s2437_s26 + $0x54] sm:$0xf]  ;;  %v2569_v43 = vld [vmem:[%s2437_s26 + $0x50] sm:$0xf] }
  0x3e   : > { %2922 = vst [vmem:[#allocation26_spill] sm:$0xff] %v2563_v41  ;;  %v2572_v44 = vld [vmem:[%s2437_s26 + $0x58] sm:$0xf0]  ;;  %v2575_v45 = vld [vmem:[%s2437_s26 + $0x54] sm:$0xf0] }
  0x3f   : > { %2923 = vst [vmem:[#allocation27_spill] sm:$0xff] %v2572_v44  ;;  %v2578_v46 = vld [vmem:[%s2437_s26 + $0x58] sm:$0xf0]  ;;  %v2581_v47 = vld [vmem:[%s2437_s26 + $0x54] sm:$0xf0] }
  0x40   : > { %2924 = vst [vmem:[#allocation28_spill] sm:$0xff] %v2575_v45  ;;  %v2584_v48 = vld [vmem:[%s2437_s26 + $0x64] sm:$0xf]  ;;  %v2587_v49 = vld [vmem:[%s2437_s26 + $0x60] sm:$0xf] }
  0x41   : > { %2925 = vst [vmem:[#allocation29_spill] sm:$0xff] %v2584_v48  ;;  %v2590_v50 = vld [vmem:[%s2437_s26 + $0x64] sm:$0xf]  ;;  %v2593_v51 = vld [vmem:[%s2437_s26 + $0x60] sm:$0xf] }
  0x42   : > { %2926 = vst [vmem:[#allocation30_spill] sm:$0xff] %v2587_v49  ;;  %v2596_v52 = vld [vmem:[%s2437_s26 + $0x68] sm:$0xf0]  ;;  %v2599_v53 = vld [vmem:[%s2437_s26 + $0x64] sm:$0xf0] }
  0x43   : > { %2927 = vst [vmem:[#allocation31_spill] sm:$0xff] %v2596_v52  ;;  %v2602_v54 = vld [vmem:[%s2437_s26 + $0x68] sm:$0xf0]  ;;  %v2605_v55 = vld [vmem:[%s2437_s26 + $0x64] sm:$0xf0] }
  0x44   : > { %2928 = vst [vmem:[#allocation32_spill] sm:$0xff] %v2599_v53  ;;  %v2608_v56 = vld [vmem:[%s2437_s26 + $0x74] sm:$0xf]  ;;  %v2611_v57 = vld [vmem:[%s2437_s26 + $0x70] sm:$0xf]  ;;  %264 = sbr.rel (%p1517_p1) target bundleno = 301 (0x12d), region = 52 }
  0x45   : > { %2929 = vst [vmem:[#allocation33_spill] sm:$0xff] %v2608_v56  ;;  %v2614_v58 = vld [vmem:[%s2437_s26 + $0x74] sm:$0xf]  ;;  %v2617_v59 = vld [vmem:[%s2437_s26 + $0x70] sm:$0xf] }
  0x46   : > { %2930 = vst [vmem:[#allocation34_spill] sm:$0xff] %v2611_v57  ;;  %v2620_v60 = vld [vmem:[%s2437_s26 + $0x78] sm:$0xf0]  ;;  %v2623_v61 = vld [vmem:[%s2437_s26 + $0x74] sm:$0xf0] }
  0x47   : > { %2931 = vst [vmem:[#allocation35_spill] sm:$0xff] %v2620_v60  ;;  %v2626_v62 = vld [vmem:[%s2437_s26 + $0x78] sm:$0xf0]  ;;  %v2629_v63 = vld [vmem:[%s2437_s26 + $0x74] sm:$0xf0] }
  0x48   : > { %2932 = vst [vmem:[#allocation36_spill] sm:$0xff] %v2623_v61 }
  0x49   : > { %v315_v56 = vld [vmem:[#allocation5 + $0x70] sm:$0xff]  ;;  %v316_v48 = vld [vmem:[#allocation5 + $0x78] sm:$0xff]  ;;  %v313_v57 = vld [vmem:[#allocation5 + $0x60] sm:$0xff] }
  0x4a   : > { %v331_v52 = vld [vmem:[#allocation5 + $0xf0] sm:$0xff]  ;;  %v340_v40 = vpack.c.bf16 %v316_v48, %v315_v56  ;;  %v332_v44 = vld [vmem:[#allocation5 + $0xf8] sm:$0xff]  ;;  %v314_v32 = vld [vmem:[#allocation5 + $0x68] sm:$0xff] }
  0x4b   : > { %v348_v36 = vpack.c.bf16 %v332_v44, %v331_v52  ;;  %v329_v60 = vld [vmem:[#allocation5 + $0xe0] sm:$0xff]  ;;  %v330_v53 = vld [vmem:[#allocation5 + $0xe8] sm:$0xff]  ;;  %v339_v61 = vpack.c.bf16 %v314_v32, %v313_v57  ;;  %v311_v24 = vld [vmem:[#allocation5 + $0x50] sm:$0xff] }
  0x4c   : > { %429 = vmatpush.bf16.msra.mxu0 %v340_v40  ;;  %1938 = vmatpush.bf16.msra.mxu2 %v340_v40  ;;  %v347_v49 = vpack.c.bf16 %v330_v53, %v329_v60  ;;  %v312_v28 = vld [vmem:[#allocation5 + $0x58] sm:$0xff]  ;;  %v327_v45 = vld [vmem:[#allocation5 + $0xd0] sm:$0xff]  ;;  %v309_v56 = vld [vmem:[#allocation5 + $0x40] sm:$0xff] }
  0x4d   : > { %478 = vmatpush.bf16.msra.mxu1 %v348_v36  ;;  %1946 = vmatpush.bf16.msra.mxu3 %v348_v36  ;;  %v328_v41 = vld [vmem:[#allocation5 + $0xd8] sm:$0xff]  ;;  %v338_v16 = vpack.c.bf16 %v312_v28, %v311_v24  ;;  %v310_v44 = vld [vmem:[#allocation5 + $0x48] sm:$0xff]  ;;  %v325_v52 = vld [vmem:[#allocation5 + $0xc0] sm:$0xff] }
  0x4e   : > { %v346_v48 = vpack.c.bf16 %v328_v41, %v327_v45  ;;  %v326_v20 = vld [vmem:[#allocation5 + $0xc8] sm:$0xff]  ;;  %v337_v32 = vpack.c.bf16 %v310_v44, %v309_v56  ;;  %v307_v40 = vld [vmem:[#allocation5 + $0x30] sm:$0xff]  ;;  %v308_v53 = vld [vmem:[#allocation5 + $0x38] sm:$0xff] }
  0x4f   : > { %v345_v36 = vpack.c.bf16 %v326_v20, %v325_v52  ;;  %v323_v57 = vld [vmem:[#allocation5 + $0xb0] sm:$0xff]  ;;  %v324_v60 = vld [vmem:[#allocation5 + $0xb8] sm:$0xff]  ;;  %v336_v24 = vpack.c.bf16 %v308_v53, %v307_v40  ;;  %v305_v41 = vld [vmem:[#allocation5 + $0x20] sm:$0xff] }
  0x50   : > { %430 = vmatpush.bf16.msra.mxu0 %v339_v61  ;;  %1939 = vmatpush.bf16.msra.mxu2 %v339_v61  ;;  %v344_v28 = vpack.c.bf16 %v324_v60, %v323_v57  ;;  %v306_v45 = vld [vmem:[#allocation5 + $0x28] sm:$0xff]  ;;  %v304_v56 = vld [vmem:[#allocation5 + $0x18] sm:$0xff]  ;;  %v319_v44 = vld [vmem:[#allocation5 + $0x90] sm:$0xff] }
  0x51   : > { %479 = vmatpush.bf16.msra.mxu1 %v347_v49  ;;  %1947 = vmatpush.bf16.msra.mxu3 %v347_v49  ;;  %v321_v49 = vld [vmem:[#allocation5 + $0xa0] sm:$0xff]  ;;  %v322_v61 = vld [vmem:[#allocation5 + $0xa8] sm:$0xff]  ;;  %v320_v52 = vld [vmem:[#allocation5 + $0x98] sm:$0xff] }
  0x52   : > { %v343_v20 = vpack.c.bf16 %v322_v61, %v321_v49  ;;  %v301_v40 = vld [vmem:[#allocation5] sm:$0xff]  ;;  %v302_v53 = vld [vmem:[#allocation5 + $0x8] sm:$0xff]  ;;  %v1526_v49 = vor.u32 %v2446_v2, %v2458_v6  ;;  %v1558_v61 = vor.u32 %v2542_v34, %v2554_v38  ;;  %v1566_v2 = vor.u32 %v2566_v42, %v2578_v46  ;;  %v268_v38 = vld [vmem:[%s265_s7 + $0x10] sm:$0xff] }
  0x53   : > { %v317_v57 = vld [vmem:[#allocation5 + $0x80] sm:$0xff]  ;;  %v318_v60 = vld [vmem:[#allocation5 + $0x88] sm:$0xff]  ;;  %v1538_v6 = vor.u32 %v2509_v23, %v2497_v19  ;;  %v1578_v19 = vor.u32 %v2629_v63, %v2617_v59  ;;  %v1550_v23 = vor.u32 %v2518_v26, %v2530_v30  ;;  %v1582_v34 = vor.u32 %v2614_v58, %v2626_v62  ;;  %287 = vst [vmem:[%s2669_s12 + $0x30] sm:$0xff] %v268_v38  ;;  %v272_v30 = vld [vmem:[%s265_s7 + $0x30] sm:$0xff] }
  0x54   : > { %431 = vmatpush.bf16.msra.mxu0 %v338_v16  ;;  %1940 = vmatpush.bf16.msra.mxu2 %v338_v16  ;;  %v335_v16 = vpack.c.bf16 %v306_v45, %v305_v41  ;;  %v1522_v41 = vor.u32 %v2461_v7, %v2449_v3  ;;  %v1554_v45 = vor.u32 %v2557_v39, %v2545_v35  ;;  %v269_v39 = vld [vmem:[%s265_s7 + $0x18] sm:$0xff]  ;;  %v270_v26 = vld [vmem:[%s265_s7 + $0x20] sm:$0xff]  ;;  %v276_v46 = vld [vmem:[%s265_s7 + $0x50] sm:$0xff] }
  0x55   : > { %480 = vmatpush.bf16.msra.mxu1 %v346_v48  ;;  %1948 = vmatpush.bf16.msra.mxu3 %v346_v48  ;;  %v303_v48 = vld [vmem:[#allocation5 + $0x10] sm:$0xff]  ;;  %v1530_v3 = vor.u32 %v2485_v15, %v2473_v11  ;;  %v1562_v7 = vor.u32 %v2581_v47, %v2569_v43  ;;  %v1534_v35 = vor.u32 %v2470_v10, %v2482_v14  ;;  %v274_v42 = vld [vmem:[%s265_s7 + $0x40] sm:$0xff]  ;;  %v275_v43 = vld [vmem:[%s265_s7 + $0x48] sm:$0xff] }
  0x56   : > { %v1570_v11 = vor.u32 %v2605_v55, %v2593_v51  ;;  %v1542_v15 = vor.u32 %v2494_v18, %v2506_v22  ;;  %v1574_v10 = vor.u32 %v2590_v50, %v2602_v54  ;;  %v1546_v14 = vor.u32 %v2533_v31, %v2521_v27  ;;  %v266_v18 = vld [vmem:[%s265_s7] sm:$0xff]  ;;  %v267_v22 = vld [vmem:[%s265_s7 + $0x8] sm:$0xff]  ;;  %288 = vst [vmem:[%s2669_s12 + $0x48] sm:$0xff] %v269_v39  ;;  %v273_v31 = vld [vmem:[%s265_s7 + $0x38] sm:$0xff] }
  0x57   : > { %285 = vst [vmem:[%s2669_s12] sm:$0xff] %v266_v18  ;;  %v271_v27 = vld [vmem:[%s265_s7 + $0x28] sm:$0xff]  ;;  %v277_v47 = vld [vmem:[%s265_s7 + $0x58] sm:$0xff]  ;;  %v278_v50 = vld [vmem:[%s265_s7 + $0x60] sm:$0xff] }
  0x58   : > { %432 = vmatpush.bf16.msra.mxu0 %v337_v32  ;;  %1941 = vmatpush.bf16.msra.mxu2 %v337_v32  ;;  %v334_v32 = vpack.c.bf16 %v304_v56, %v303_v48  ;;  %286 = vst [vmem:[%s2669_s12 + $0x18] sm:$0xff] %v267_v22  ;;  %v279_v51 = vld [vmem:[%s265_s7 + $0x68] sm:$0xff]  ;;  %v280_v54 = vld [vmem:[%s265_s7 + $0x70] sm:$0xff]  ;;  %v281_v55 = vld [vmem:[%s265_s7 + $0x78] sm:$0xff] }
  0x59   : > { %481 = vmatpush.bf16.msra.mxu1 %v345_v36  ;;  %1949 = vmatpush.bf16.msra.mxu3 %v345_v36  ;;  %v342_v36 = vpack.c.bf16 %v320_v52, %v319_v44  ;;  %289 = vst [vmem:[%s2669_s12 + $0x60] sm:$0xff] %v270_v26 }
  0x5a   : > { %290 = vst [vmem:[%s2669_s12 + $0x78] sm:$0xff] %v271_v27 }
  0x5b   : > { %291 = vst [vmem:[%s2669_s12 + $0x90] sm:$0xff] %v272_v30 }
  0x5c   : > { %433 = vmatpush.bf16.msra.mxu0 %v336_v24  ;;  %1942 = vmatpush.bf16.msra.mxu2 %v336_v24  ;;  %v333_v24 = vpack.c.bf16 %v302_v53, %v301_v40  ;;  %292 = vst [vmem:[%s2669_s12 + $0xa8] sm:$0xff] %v273_v31 }
  0x5d   : > { %482 = vmatpush.bf16.msra.mxu1 %v344_v28  ;;  %1950 = vmatpush.bf16.msra.mxu3 %v344_v28  ;;  %v341_v28 = vpack.c.bf16 %v318_v60, %v317_v57  ;;  %293 = vst [vmem:[%s2669_s12 + $0xc0] sm:$0xff] %v274_v42 }
  0x5e   : > { %294 = vst [vmem:[%s2669_s12 + $0xd8] sm:$0xff] %v275_v43 }
  0x5f   : > { %295 = vst [vmem:[%s2669_s12 + $0xf0] sm:$0xff] %v276_v46 }
  0x60   : > { %434 = vmatpush.bf16.msra.mxu0 %v335_v16  ;;  %1943 = vmatpush.bf16.msra.mxu2 %v335_v16  ;;  %296 = vst [vmem:[%s2669_s12 + $0x108] sm:$0xff] %v277_v47 }
  0x61   : > { %483 = vmatpush.bf16.msra.mxu1 %v343_v20  ;;  %1951 = vmatpush.bf16.msra.mxu3 %v343_v20  ;;  %297 = vst [vmem:[%s2669_s12 + $0x120] sm:$0xff] %v278_v50 }
  0x62   : > { %298 = vst [vmem:[%s2669_s12 + $0x138] sm:$0xff] %v279_v51 }
  0x63   : > { %299 = vst [vmem:[%s2669_s12 + $0x150] sm:$0xff] %v280_v54 }
  0x64   : > { %435 = vmatpush.bf16.msra.mxu0 %v334_v32  ;;  %1944 = vmatpush.bf16.msra.mxu2 %v334_v32  ;;  %300 = vst [vmem:[%s2669_s12 + $0x168] sm:$0xff] %v281_v55 }
  0x65   : > { %484 = vmatpush.bf16.msra.mxu1 %v342_v36  ;;  %1952 = vmatpush.bf16.msra.mxu3 %v342_v36 }
  0x68   : > { %436 = vmatpush.bf16.msra.mxu0 %v333_v24  ;;  %1945 = vmatpush.bf16.msra.mxu2 %v333_v24 }
  0x69   : > { %485 = vmatpush.bf16.msra.mxu1 %v341_v28  ;;  %1953 = vmatpush.bf16.msra.mxu3 %v341_v28 }
  0x6b   : > { %437 = vmatmul.bf16.vlgmr.msra.gmra.mxu0 %v1522_v41  ;;  %457 = vmatmul.bf16.vlgmr.msra.gmra.mxu2 %v1554_v45 }
  0x6c   : > { %486 = vmatmul.bf16.vlgmr.msra.gmra.mxu1 %v1526_v49  ;;  %506 = vmatmul.bf16.vlgmr.msra.gmra.mxu3 %v1558_v61 }
  0x7b   : > { %442 = vmatmul.bf16.gmra.mxu0 %v1530_v3  ;;  %462 = vmatmul.bf16.gmra.mxu2 %v1562_v7 }
  0x7c   : > { %491 = vmatmul.bf16.gmra.mxu1 %v1534_v35  ;;  %511 = vmatmul.bf16.gmra.mxu3 %v1566_v2 }
  0x8b   : > { %447 = vmatmul.bf16.gmra.mxu0 %v1538_v6  ;;  %467 = vmatmul.bf16.gmra.mxu2 %v1570_v11 }
  0x8c   : > { %496 = vmatmul.bf16.gmra.mxu1 %v1542_v15  ;;  %516 = vmatmul.bf16.gmra.mxu3 %v1574_v10 }
  0x9b   : > { %452 = vmatmul.bf16.gmra.mxu0 %v1546_v14  ;;  %472 = vmatmul.bf16.gmra.mxu2 %v1578_v19 }
  0x9c   : > { %501 = vmatmul.bf16.gmra.mxu1 %v1550_v23  ;;  %521 = vmatmul.bf16.gmra.mxu3 %v1582_v34 }
  0xe8   : > { %v438_v58 = vpop.f32.mrf.mxu0 }
  0xe9   : > { %v487_v59 = vpop.f32.mrf.mxu1 }
  0xea   : > { %v488_v62 = vadd.f32 %v487_v59, %v438_v58 }
  0xec   : > { %527 = vst [vmem:[%s2669_s12 + $0x8] sm:$0xff] %v488_v62 }
  0xee   : > { %v458_v63 = vpop.f32.mrf.mxu2 }
  0xef   : > { %v507_v16 = vpop.f32.mrf.mxu3 }
  0xf0   : > { %v508_v20 = vadd.f32 %v507_v16, %v458_v63  ;;  %v440_v48 = vpop.f32.mrf.mxu0 }
  0xf1   : > { %v489_v56 = vpop.f32.mrf.mxu1 }
  0xf2   : > { %535 = vst [vmem:[%s2669_s12 + $0xc8] sm:$0xff] %v508_v20  ;;  %v490_v44 = vadd.f32 %v489_v56, %v440_v48 }
  0xf4   : > { %528 = vst [vmem:[%s2669_s12 + $0x20] sm:$0xff] %v490_v44  ;;  %v1894_v52 = vpack.c.bf16 %v490_v44, %v488_v62 }
  0xf6   : > { %1895 = vst [vmem:[%s2691_s14] sm:$0xff] %v1894_v52   ;;  %v460_v32 = vpop.f32.mrf.mxu2 }
  0xf7   : > { %v509_v36 = vpop.f32.mrf.mxu3 }
  0xf8   : > { %v510_v40 = vadd.f32 %v509_v36, %v460_v32  ;;  %v443_v53 = vpop.f32.mrf.mxu0 }
  0xf9   : > { %v492_v57 = vpop.f32.mrf.mxu1 }
  0xfa   : > { %536 = vst [vmem:[%s2669_s12 + $0xe0] sm:$0xff] %v510_v40  ;;  %v1914_v60 = vpack.c.bf16 %v510_v40, %v508_v20  ;;  %v493_v24 = vadd.f32 %v492_v57, %v443_v53 }
  0xfc   : > { %1934 = vst [vmem:[%s2691_s14 + $0x20] sm:$0xff] %v1914_v60  }
  0xfd   : > { %529 = vst [vmem:[%s2669_s12 + $0x38] sm:$0xff] %v493_v24 }
  0xfe   : > { %v463_v28 = vpop.f32.mrf.mxu2 }
  0xff   : > { %v512_v41 = vpop.f32.mrf.mxu3 }
 0x100   : > { %v513_v45 = vadd.f32 %v512_v41, %v463_v28  ;;  %v445_v49 = vpop.f32.mrf.mxu0 }
 0x101   : > { %v494_v61 = vpop.f32.mrf.mxu1 }
 0x102   : > { %537 = vst [vmem:[%s2669_s12 + $0xf8] sm:$0xff] %v513_v45  ;;  %v495_v3 = vadd.f32 %v494_v61, %v445_v49 }
 0x104   : > { %530 = vst [vmem:[%s2669_s12 + $0x50] sm:$0xff] %v495_v3  ;;  %v1899_v7 = vpack.c.bf16 %v495_v3, %v493_v24 }
 0x106   : > { %1931 = vst [vmem:[%s2691_s14 + $0x8] sm:$0xff] %v1899_v7   ;;  %v465_v35 = vpop.f32.mrf.mxu2 }
 0x107   : > { %v514_v2 = vpop.f32.mrf.mxu3 }
 0x108   : > { %v515_v6 = vadd.f32 %v514_v2, %v465_v35  ;;  %v448_v11 = vpop.f32.mrf.mxu0 }
 0x109   : > { %v497_v15 = vpop.f32.mrf.mxu1 }
 0x10a   : > { %538 = vst [vmem:[%s2669_s12 + $0x110] sm:$0xff] %v515_v6  ;;  %v1919_v10 = vpack.c.bf16 %v515_v6, %v513_v45  ;;  %v498_v14 = vadd.f32 %v497_v15, %v448_v11 }
 0x10c   : > { %1935 = vst [vmem:[%s2691_s14 + $0x28] sm:$0xff] %v1919_v10  }
 0x10d   : > { %531 = vst [vmem:[%s2669_s12 + $0x68] sm:$0xff] %v498_v14 }
 0x10e   : > { %v468_v19 = vpop.f32.mrf.mxu2 }
 0x10f   : > { %v517_v23 = vpop.f32.mrf.mxu3 }
 0x110   : > { %v518_v34 = vadd.f32 %v517_v23, %v468_v19  ;;  %v450_v18 = vpop.f32.mrf.mxu0 }
 0x111   : > { %v499_v22 = vpop.f32.mrf.mxu1 }
 0x112   : > { %539 = vst [vmem:[%s2669_s12 + $0x128] sm:$0xff] %v518_v34  ;;  %v500_v38 = vadd.f32 %v499_v22, %v450_v18 }
 0x114   : > { %532 = vst [vmem:[%s2669_s12 + $0x80] sm:$0xff] %v500_v38  ;;  %v1904_v39 = vpack.c.bf16 %v500_v38, %v498_v14 }
 0x116   : > { %1932 = vst [vmem:[%s2691_s14 + $0x10] sm:$0xff] %v1904_v39   ;;  %v470_v26 = vpop.f32.mrf.mxu2 }
 0x117   : > { %v519_v27 = vpop.f32.mrf.mxu3 }
 0x118   : > { %v520_v30 = vadd.f32 %v519_v27, %v470_v26  ;;  %v453_v31 = vpop.f32.mrf.mxu0 }
 0x119   : > { %v502_v42 = vpop.f32.mrf.mxu1 }
 0x11a   : > { %540 = vst [vmem:[%s2669_s12 + $0x140] sm:$0xff] %v520_v30  ;;  %v1924_v43 = vpack.c.bf16 %v520_v30, %v518_v34  ;;  %v503_v46 = vadd.f32 %v502_v42, %v453_v31 }
 0x11c   : > { %1936 = vst [vmem:[%s2691_s14 + $0x30] sm:$0xff] %v1924_v43  }
 0x11d   : > { %533 = vst [vmem:[%s2669_s12 + $0x98] sm:$0xff] %v503_v46 }
 0x11e   : > { %v473_v47 = vpop.f32.mrf.mxu2 }
 0x11f   : > { %v522_v50 = vpop.f32.mrf.mxu3 }
 0x120   : > { %v523_v51 = vadd.f32 %v522_v50, %v473_v47  ;;  %v455_v54 = vpop.f32.mrf.mxu0 }
 0x121   : > { %v504_v55 = vpop.f32.mrf.mxu1 }
 0x122   : > { %541 = vst [vmem:[%s2669_s12 + $0x158] sm:$0xff] %v523_v51  ;;  %v505_v58 = vadd.f32 %v504_v55, %v455_v54 }
 0x124   : > { %534 = vst [vmem:[%s2669_s12 + $0xb0] sm:$0xff] %v505_v58  ;;  %v1909_v59 = vpack.c.bf16 %v505_v58, %v503_v46 }
 0x126   : > { %1933 = vst [vmem:[%s2691_s14 + $0x18] sm:$0xff] %v1909_v59   ;;  %v475_v62 = vpop.f32.mrf.mxu2 }
 0x127   : > { %v524_v63 = vpop.f32.mrf.mxu3 }
 0x128   : > { %v525_v16 = vadd.f32 %v524_v63, %v475_v62 }
 0x12a   : > { %542 = vst [vmem:[%s2669_s12 + $0x170] sm:$0xff] %v525_v16  ;;  %v1929_v20 = vpack.c.bf16 %v525_v16, %v523_v51 }
 0x12c   : > { %1937 = vst [vmem:[%s2691_s14 + $0x38] sm:$0xff] %v1929_v20  }
 0x12d PF: > { %p1584_p2 = scmp.ne.s32.totalorder %s2267_s19, 1 }
 0x12e   : > { %s1865_s19 = smul.u32 (!%p1584_p2), 24, %s2434_s25 }
 0x12f   : > { %580 = sbr.rel (%p1584_p2) target bundleno = 763 (0x2fb), region = 56 }
 0x130   : > { %s2744_s23 = scalar_lea.vmem (!%p1584_p2), [#allocation2], %s1865_s19 }
 0x134   : > { %v1856_v48 = vld [vmem:[#allocation3 + $0x38] sm:$0xff]  ;;  %v1855_v56 = vld [vmem:[#allocation3 + $0x30] sm:$0xff]  ;;  %v1854_v44 = vld [vmem:[#allocation3 + $0x28] sm:$0xff]  ;;  %v1604_v60 = vor.u32 %v2503_v21, %v2491_v17  ;;  %v1588_v24 = vor.u32 %v2455_v5, %v2443_v1  ;;  %v1612_v17 = vor.u32 %v2527_v29, %v2515_v25  ;;  %v1596_v1 = vor.u32 %v2479_v13, %v2467_v9 }
 0x135   : > { %1954 = vmatpush.bf16.msra.mxu1 %v1856_v48  ;;  %789 = vmatpush.bf16.msra.mxu0 %v1856_v48  ;;  %v1853_v52 = vld [vmem:[#allocation3 + $0x20] sm:$0xff]  ;;  %v1852_v32 = vld [vmem:[#allocation3 + $0x18] sm:$0xff]  ;;  %v1851_v36 = vld [vmem:[#allocation3 + $0x10] sm:$0xff]  ;;  %v1592_v3 = vor.u32 %v2440_v0, %v2452_v4  ;;  %v1600_v7 = vor.u32 %v2464_v8, %v2476_v12  ;;  %v1620_v9 = vor.u32 %v2551_v37, %v2539_v33 }
 0x136   : > { %1955 = vmatpush.bf16.msra.mxu2 %v1856_v48  ;;  %1956 = vmatpush.bf16.msra.mxu3 %v1856_v48  ;;  %v1850_v40 = vld [vmem:[#allocation3 + $0x8] sm:$0xff]  ;;  %v1849_v53 = vld [vmem:[#allocation3] sm:$0xff]  ;;  %v1864_v57 = vld [vmem:[#allocation3 + $0x78] sm:$0xff] }
 0x137   : > { %v1863_v28 = vld [vmem:[#allocation3 + $0x70] sm:$0xff]  ;;  %v1862_v41 = vld [vmem:[#allocation3 + $0x68] sm:$0xff]  ;;  %v1861_v45 = vld [vmem:[#allocation3 + $0x60] sm:$0xff] }
 0x138   : > { %v1860_v49 = vld [vmem:[#allocation3 + $0x58] sm:$0xff]  ;;  %v1859_v5 = vld [vmem:[#allocation3 + $0x50] sm:$0xff]  ;;  %v1858_v21 = vld [vmem:[#allocation3 + $0x48] sm:$0xff] }
 0x139   : > { %1957 = vmatpush.bf16.msra.mxu1 %v1855_v56  ;;  %790 = vmatpush.bf16.msra.mxu0 %v1855_v56  ;;  %v1857_v61 = vld [vmem:[#allocation3 + $0x40] sm:$0xff]  ;;  %v2933_v13 = vld [vmem:[#allocation20_spill] sm:$0xff]  ;;  %v2935_v35 = vld [vmem:[#allocation26_spill] sm:$0xff] }
 0x13a   : > { %1958 = vmatpush.bf16.msra.mxu2 %v1855_v56  ;;  %1959 = vmatpush.bf16.msra.mxu3 %v1855_v56  ;;  %v2934_v25 = vld [vmem:[#allocation19_spill] sm:$0xff]  ;;  %v2936_v2 = vld [vmem:[#allocation28_spill] sm:$0xff]  ;;  %v2937_v11 = vld [vmem:[#allocation22_spill] sm:$0xff] }
 0x13b   : > { %v1608_v29 = vor.u32 %v2934_v25, %v2933_v13  ;;  %v1628_v6 = vor.u32 %v2936_v2, %v2935_v35  ;;  %v2938_v15 = vld [vmem:[#allocation21_spill] sm:$0xff]  ;;  %v2939_v4 = vld [vmem:[#allocation30_spill] sm:$0xff]  ;;  %v2940_v10 = vld [vmem:[#allocation32_spill] sm:$0xff] }
 0x13c   : > { %v1616_v0 = vor.u32 %v2938_v15, %v2937_v11  ;;  %v1636_v8 = vor.u32 %v2940_v10, %v2939_v4  ;;  %v1873_v12 = vld [vmem:[#allocation10 + $0x38] sm:$0xff]  ;;  %v2941_v14 = vld [vmem:[#allocation24_spill] sm:$0xff]  ;;  %v2942_v33 = vld [vmem:[#allocation23_spill] sm:$0xff] }
 0x13d   : > { %1960 = vmatpush.bf16.msra.mxu1 %v1854_v44  ;;  %791 = vmatpush.bf16.msra.mxu0 %v1854_v44  ;;  %v1624_v37 = vor.u32 %v2942_v33, %v2941_v14  ;;  %v1881_v19 = vld [vmem:[#allocation10 + $0x78] sm:$0xff]  ;;  %v1872_v23 = vld [vmem:[#allocation10 + $0x30] sm:$0xff]  ;;  %v2944_v18 = vld [vmem:[#allocation36_spill] sm:$0xff] }
 0x13e   : > { %1961 = vmatpush.bf16.msra.mxu2 %v1854_v44  ;;  %1962 = vmatpush.bf16.msra.mxu3 %v1854_v44  ;;  %v2943_v34 = vld [vmem:[#allocation34_spill] sm:$0xff]  ;;  %v1880_v38 = vld [vmem:[#allocation10 + $0x70] sm:$0xff]  ;;  %v1871_v39 = vld [vmem:[#allocation10 + $0x28] sm:$0xff] }
 0x13f   : > { %v1644_v22 = vor.u32 %v2944_v18, %v2943_v34  ;;  %v1879_v26 = vld [vmem:[#allocation10 + $0x68] sm:$0xff]  ;;  %v1870_v27 = vld [vmem:[#allocation10 + $0x20] sm:$0xff]  ;;  %v1869_v31 = vld [vmem:[#allocation10 + $0x18] sm:$0xff] }
 0x140   : > { %v1878_v30 = vld [vmem:[#allocation10 + $0x60] sm:$0xff]  ;;  %v2946_v43 = vld [vmem:[#allocation25_spill] sm:$0xff]  ;;  %v1889_v47 = vld [vmem:[#allocation10 + $0xb8] sm:$0xff] }
 0x141   : > { %1963 = vmatpush.bf16.msra.mxu1 %v1853_v52  ;;  %792 = vmatpush.bf16.msra.mxu0 %v1853_v52  ;;  %v2945_v42 = vld [vmem:[#allocation27_spill] sm:$0xff]  ;;  %v1877_v50 = vld [vmem:[#allocation10 + $0x58] sm:$0xff]  ;;  %v1868_v51 = vld [vmem:[#allocation10 + $0x10] sm:$0xff] }
 0x142   : > { %1964 = vmatpush.bf16.msra.mxu2 %v1853_v52  ;;  %1965 = vmatpush.bf16.msra.mxu3 %v1853_v52  ;;  %v1632_v46 = vor.u32 %v2946_v43, %v2945_v42  ;;  %v1888_v54 = vld [vmem:[#allocation10 + $0xb0] sm:$0xff]  ;;  %v1867_v58 = vld [vmem:[#allocation10 + $0x8] sm:$0xff]  ;;  %v1866_v63 = vld [vmem:[#allocation10] sm:$0xff] }
 0x143   : > { %v1876_v55 = vld [vmem:[#allocation10 + $0x50] sm:$0xff]  ;;  %v1887_v59 = vld [vmem:[#allocation10 + $0xa8] sm:$0xff]  ;;  %v906_v16 = vld [vmem:[%s2744_s23] sm:$0xff] }
 0x144   : > { %v1875_v62 = vld [vmem:[#allocation10 + $0x48] sm:$0xff]  ;;  %v1886_v20 = vld [vmem:[#allocation10 + $0xa0] sm:$0xff]  ;;  %v957_v56 = vld [vmem:[%s2744_s23 + $0x18] sm:$0xff] }
 0x145   : > { %1966 = vmatpush.bf16.msra.mxu1 %v1852_v32  ;;  %793 = vmatpush.bf16.msra.mxu0 %v1852_v32  ;;  %v1874_v48 = vld [vmem:[#allocation10 + $0x40] sm:$0xff]  ;;  %v1002_v44 = vpack.c.bf16 %v957_v56, %v906_v16  ;;  %v955_v52 = vld [vmem:[%s2744_s23 + $0x8] sm:$0xff]  ;;  %v2771_v34 = vld [vmem:[%s2744_s23 + $0x90] sm:$0xff] }
 0x146   : > { %1967 = vmatpush.bf16.msra.mxu2 %v1852_v32  ;;  %1968 = vmatpush.bf16.msra.mxu3 %v1852_v32  ;;  %v958_v32 = vld [vmem:[%s2744_s23 + $0x20] sm:$0xff]  ;;  %v967_v15 = vld [vmem:[%s2744_s23 + $0x68] sm:$0xff] }
 0x147   : > { %v910_v2 = vld [vmem:[%s2744_s23 + $0x60] sm:$0xff]  ;;  %v2774_v18 = vld [vmem:[%s2744_s23 + $0xa8] sm:$0xff] }
 0x149   : > { %1969 = vmatpush.bf16.msra.mxu1 %v1851_v36  ;;  %794 = vmatpush.bf16.msra.mxu0 %v1851_v36 }
 0x14a   : > { %1970 = vmatpush.bf16.msra.mxu2 %v1851_v36  ;;  %1971 = vmatpush.bf16.msra.mxu3 %v1851_v36  ;;  %v2947_v36 = vld [vmem:[#allocation31_spill] sm:$0xff] }
 0x14d   : > { %1972 = vmatpush.bf16.msra.mxu1 %v1850_v40  ;;  %795 = vmatpush.bf16.msra.mxu0 %v1850_v40 }
 0x14e   : > { %1973 = vmatpush.bf16.msra.mxu2 %v1850_v40  ;;  %1974 = vmatpush.bf16.msra.mxu3 %v1850_v40  ;;  %v2948_v40 = vld [vmem:[#allocation29_spill] sm:$0xff] }
 0x151   : > { %1975 = vmatpush.bf16.msra.mxu1 %v1849_v53  ;;  %796 = vmatpush.bf16.msra.mxu0 %v1849_v53 }
 0x152   : > { %1976 = vmatpush.bf16.msra.mxu2 %v1849_v53  ;;  %1977 = vmatpush.bf16.msra.mxu3 %v1849_v53  ;;  %v1640_v53 = vor.u32 %v2948_v40, %v2947_v36 }
 0x154   : > { %807 = vmatmul.bf16.vlgmr.msra.gmra.mxu1 %v1604_v60  ;;  %797 = vmatmul.bf16.vlgmr.msra.gmra.mxu0 %v1588_v24  ;;  %v1885_v24 = vld [vmem:[#allocation10 + $0x98] sm:$0xff] }
 0x155   : > { %838 = vmatpush.bf16.msrb.mxu1 %v1864_v57  ;;  %817 = vmatmul.bf16.vlgmr.msra.gmra.mxu2 %v1620_v9  ;;  %v1003_v57 = vpack.c.bf16 %v958_v32, %v955_v52 }
 0x156   : > { %827 = vmatmul.bf16.vlgmr.msra.gmra.mxu3 %v1636_v8  ;;  %1222 = vmatpush.bf16.msrb.mxu2 %v1873_v12 }
 0x157   : > { %1271 = vmatpush.bf16.msrb.mxu3 %v1881_v19  ;;  %1320 = vmatpush.bf16.msrb.mxu0 %v1889_v47 }
 0x159   : > { %839 = vmatpush.bf16.msrb.mxu1 %v1863_v28  ;;  %v1884_v28 = vld [vmem:[#allocation10 + $0x90] sm:$0xff] }
 0x15a   : > { %1223 = vmatpush.bf16.msrb.mxu2 %v1872_v23 }
 0x15b   : > { %1272 = vmatpush.bf16.msrb.mxu3 %v1880_v38  ;;  %1321 = vmatpush.bf16.msrb.mxu0 %v1888_v54  ;;  %v1011_v38 = vpack.c.bf16 %v2774_v18, %v2771_v34 }
 0x15d   : > { %840 = vmatpush.bf16.msrb.mxu1 %v1862_v41 }
 0x15e   : > { %1224 = vmatpush.bf16.msrb.mxu2 %v1871_v39 }
 0x15f   : > { %1273 = vmatpush.bf16.msrb.mxu3 %v1879_v26  ;;  %1322 = vmatpush.bf16.msrb.mxu0 %v1887_v59  ;;  %v973_v26 = vld [vmem:[%s2744_s23 + $0x98] sm:$0xff] }
 0x160   : > { %v2784_v59 = vld [vmem:[%s2744_s23 + $0xd8] sm:$0xff] }
 0x161   : > { %841 = vmatpush.bf16.msrb.mxu1 %v1861_v45  ;;  %v1883_v45 = vld [vmem:[#allocation10 + $0x88] sm:$0xff] }
 0x162   : > { %1225 = vmatpush.bf16.msrb.mxu2 %v1870_v27  ;;  %v976_v27 = vld [vmem:[%s2744_s23 + $0xb0] sm:$0xff] }
 0x163   : > { %1274 = vmatpush.bf16.msrb.mxu3 %v1878_v30  ;;  %1323 = vmatpush.bf16.msrb.mxu0 %v1886_v20  ;;  %v982_v20 = vld [vmem:[%s2744_s23 + $0xe0] sm:$0xff] }
 0x164   : > { %812 = vmatmul.bf16.gmra.mxu1 %v1612_v17  ;;  %802 = vmatmul.bf16.gmra.mxu0 %v1596_v1  ;;  %v1882_v17 = vld [vmem:[#allocation10 + $0x80] sm:$0xff]  ;;  %v963_v1 = vld [vmem:[%s2744_s23 + $0x48] sm:$0xff] }
 0x165   : > { %842 = vmatpush.bf16.msrb.mxu1 %v1860_v49  ;;  %822 = vmatmul.bf16.gmra.mxu2 %v1628_v6  ;;  %v908_v49 = vld [vmem:[%s2744_s23 + $0x30] sm:$0xff]  ;;  %v969_v6 = vld [vmem:[%s2744_s23 + $0x78] sm:$0xff] }
 0x166   : > { %832 = vmatmul.bf16.gmra.mxu3 %v1644_v22  ;;  %1226 = vmatpush.bf16.msrb.mxu2 %v1869_v31  ;;  %v1008_v11 = vpack.c.bf16 %v969_v6, %v910_v2  ;;  %v1012_v31 = vpack.c.bf16 %v976_v27, %v973_v26  ;;  %v997_v27 = vld [vmem:[%s2744_s23 + $0x158] sm:$0xff] }
 0x167   : > { %1275 = vmatpush.bf16.msrb.mxu3 %v1877_v50  ;;  %1324 = vmatpush.bf16.msrb.mxu0 %v1885_v24  ;;  %v2793_v24 = vld [vmem:[%s2744_s23 + $0xf0] sm:$0xff] }
 0x169   : > { %843 = vmatpush.bf16.msrb.mxu1 %v1859_v5  ;;  %v1005_v5 = vpack.c.bf16 %v963_v1, %v908_v49 }
 0x16a   : > { %1227 = vmatpush.bf16.msrb.mxu2 %v1868_v51 }
 0x16b   : > { %1276 = vmatpush.bf16.msrb.mxu3 %v1876_v55  ;;  %1325 = vmatpush.bf16.msrb.mxu0 %v1884_v28  ;;  %v987_v28 = vld [vmem:[%s2744_s23 + $0x108] sm:$0xff] }
 0x16d   : > { %844 = vmatpush.bf16.msrb.mxu1 %v1858_v21  ;;  %v961_v21 = vld [vmem:[%s2744_s23 + $0x38] sm:$0xff] }
 0x16e   : > { %1228 = vmatpush.bf16.msrb.mxu2 %v1867_v58  ;;  %v2781_v58 = vld [vmem:[%s2744_s23 + $0xc0] sm:$0xff] }
 0x16f   : > { %1277 = vmatpush.bf16.msrb.mxu3 %v1875_v62  ;;  %1326 = vmatpush.bf16.msrb.mxu0 %v1883_v45 }
 0x171   : > { %845 = vmatpush.bf16.msrb.mxu1 %v1857_v61  ;;  %v964_v61 = vld [vmem:[%s2744_s23 + $0x50] sm:$0xff] }
 0x172   : > { %1229 = vmatpush.bf16.msrb.mxu2 %v1866_v63  ;;  %v1006_v13 = vpack.c.bf16 %v964_v61, %v961_v21  ;;  %v1014_v63 = vpack.c.bf16 %v2784_v59, %v2781_v58 }
 0x173   : > { %1278 = vmatpush.bf16.msrb.mxu3 %v1874_v48  ;;  %1327 = vmatpush.bf16.msrb.mxu0 %v1882_v17  ;;  %v985_v17 = vld [vmem:[%s2744_s23 + $0xf8] sm:$0xff] }
 0x174   : > { %846 = vmatmul.bf16.vlgmr.msrb.gmra.mxu1 %v1592_v3  ;;  %v2949_v3 = vld [vmem:[#allocation35_spill] sm:$0xff] }
 0x175   : > { %1230 = vmatmul.bf16.vlgmr.msrb.gmra.mxu2 %v1002_v44 }
 0x176   : > { %1279 = vmatmul.bf16.vlgmr.msrb.gmra.mxu3 %v1003_v57 }
 0x184   : > { %851 = vmatmul.bf16.gmra.mxu1 %v1600_v7  ;;  %v2950_v7 = vld [vmem:[#allocation33_spill] sm:$0xff] }
 0x185   : > { %v1648_v9 = vor.u32 %v2950_v7, %v2949_v3  ;;  %1235 = vmatmul.bf16.gmra.mxu2 %v1005_v5 }
 0x186   : > { %1284 = vmatmul.bf16.gmra.mxu3 %v1006_v13 }
 0x194   : > { %856 = vmatmul.bf16.gmra.mxu1 %v1608_v29 }
 0x195   : > { %1240 = vmatmul.bf16.gmra.mxu2 %v1008_v11 }
 0x1a4   : > { %861 = vmatmul.bf16.gmra.mxu1 %v1616_v0  ;;  %v970_v0 = vld [vmem:[%s2744_s23 + $0x80] sm:$0xff] }
 0x1a5   : > { %v1009_v4 = vpack.c.bf16 %v970_v0, %v967_v15  ;;  %1245 = vmatmul.bf16.gmra.mxu2 %v1011_v38  ;;  %v991_v0 = vld [vmem:[%s2744_s23 + $0x128] sm:$0xff] }
 0x1a7   : > { %1289 = vmatmul.bf16.gmra.mxu3 %v1009_v4  ;;  %v994_v4 = vld [vmem:[%s2744_s23 + $0x140] sm:$0xff] }
 0x1b4   : > { %866 = vmatmul.bf16.gmra.mxu1 %v1624_v37 }
 0x1b5   : > { %1250 = vmatmul.bf16.gmra.mxu2 %v1014_v63 }
 0x1b7   : > { %1294 = vmatmul.bf16.gmra.mxu3 %v1012_v31 }
 0x1c4   : > { %871 = vmatmul.bf16.gmra.mxu1 %v1632_v46 }
 0x1d1   : > { %v2752_v60 = vpop.f32.mrf.mxu1  ;;  %v798_v35 = vpop.f32.mrf.mxu0 }
 0x1d4   : > { %876 = vmatmul.bf16.gmra.mxu1 %v1640_v53 }
 0x1d8   : > { %v818_v13 = vpop.f32.mrf.mxu2 }
 0x1d9   : > { %v2754_v41 = vpop.f32.mrf.mxu1  ;;  %v800_v14 = vpop.f32.mrf.mxu0 }
 0x1e1   : > { %v2762_v25 = vpop.f32.mrf.mxu1  ;;  %v803_v39 = vpop.f32.mrf.mxu0 }
 0x1e4   : > { %881 = vmatmul.bf16.gmra.mxu1 %v1648_v9 }
 0x1e9   : > { %v2764_v29 = vpop.f32.mrf.mxu1  ;;  %v805_v50 = vpop.f32.mrf.mxu0 }
 0x1f1   : > { %v847_v10 = vpop.f32.mrf.mxu1 }
 0x1f2   : > { %v848_v8 = vadd.f32 %v847_v10, %v798_v35  ;;  %v1021_v10 = vpack.c.bf16 %v994_v4, %v991_v0 }
 0x1f4   : > { %v887_v12 = vmul.f32 2.0, %v848_v8 }
 0x1f6   : > { %v922_v33 = vsub.f32 %v887_v12, %v906_v16  ;;  %v979_v16 = vld [vmem:[%s2744_s23 + $0xc8] sm:$0xff] }
 0x1f9   : > { %v849_v37 = vpop.f32.mrf.mxu1 }
 0x1fa   : > { %v850_v19 = vadd.f32 %v849_v37, %v800_v14  ;;  %v820_v14 = vpop.f32.mrf.mxu2  ;;  %v828_v37 = vpop.f32.mrf.mxu3 }
 0x1fc   : > { %v888_v23 = vmul.f32 2.0, %v850_v19 }
 0x1fe   : > { %v923_v22 = vsub.f32 %v888_v23, %v957_v56  ;;  %v1015_v56 = vpack.c.bf16 %v982_v20, %v979_v16 }
 0x200   : > { %v1004_v30 = vpack.c.bf16 %v923_v22, %v922_v33  ;;  %1299 = vmatmul.bf16.gmra.mxu3 %v1015_v56  ;;  %v999_v22 = vld [vmem:[%s2744_s23 + $0x168] sm:$0xff] }
 0x201   : > { %v852_v42 = vpop.f32.mrf.mxu1 }
 0x202   : > { %v853_v43 = vadd.f32 %v852_v42, %v803_v39  ;;  %1328 = vmatmul.bf16.vlgmr.msrb.gmra.mxu0 %v1004_v30  ;;  %v823_v26 = vpop.f32.mrf.mxu2  ;;  %v1000_v30 = vld [vmem:[%s2744_s23 + $0x170] sm:$0xff] }
 0x203   : > { %v1024_v42 = vpack.c.bf16 %v1000_v30, %v997_v27 }
 0x204   : > { %v889_v46 = vmul.f32 2.0, %v853_v43 }
 0x206   : > { %v924_v47 = vsub.f32 %v889_v46, %v908_v49  ;;  %v1017_v49 = vpack.c.bf16 %v987_v28, %v2793_v24  ;;  %v830_v46 = vpop.f32.mrf.mxu3 }
 0x208   : > { %1255 = vmatmul.bf16.gmra.mxu2 %v1017_v49 }
 0x209   : > { %v854_v51 = vpop.f32.mrf.mxu1 }
 0x20a   : > { %v855_v54 = vadd.f32 %v854_v51, %v805_v50 }
 0x20c   : > { %v890_v55 = vmul.f32 2.0, %v855_v54  ;;  %v825_v54 = vpop.f32.mrf.mxu2 }
 0x20e   : > { %v925_v62 = vsub.f32 %v890_v55, %v963_v1  ;;  %v988_v1 = vld [vmem:[%s2744_s23 + $0x110] sm:$0xff] }
 0x210   : > { %v1007_v48 = vpack.c.bf16 %v925_v62, %v924_v47  ;;  %v833_v62 = vpop.f32.mrf.mxu3 }
 0x211   : > { %v857_v44 = vpop.f32.mrf.mxu1 }
 0x212   : > { %v858_v52 = vadd.f32 %v857_v44, %v2752_v60  ;;  %1333 = vmatmul.bf16.gmra.mxu0 %v1007_v48  ;;  %v1018_v60 = vpack.c.bf16 %v988_v1, %v985_v17 }
 0x214   : > { %v891_v32 = vmul.f32 2.0, %v858_v52  ;;  %1304 = vmatmul.bf16.gmra.mxu3 %v1018_v60 }
 0x216   : > { %v926_v36 = vsub.f32 %v891_v32, %v910_v2  ;;  %v918_v2 = vld [vmem:[%s2744_s23 + $0x120] sm:$0xff] }
 0x218   : > { %v835_v44 = vpop.f32.mrf.mxu3 }
 0x219   : > { %v859_v40 = vpop.f32.mrf.mxu1 }
 0x21a   : > { %v860_v53 = vadd.f32 %v859_v40, %v2754_v41 }
 0x21c   : > { %v892_v57 = vmul.f32 2.0, %v860_v53 }
 0x21e   : > { %v927_v45 = vsub.f32 %v892_v57, %v969_v6  ;;  %v993_v6 = vld [vmem:[%s2744_s23 + $0x138] sm:$0xff] }
 0x21f   : > { %v1020_v15 = vpack.c.bf16 %v993_v6, %v918_v2 }
 0x220   : > { %v1010_v5 = vpack.c.bf16 %v927_v45, %v926_v36  ;;  %v1231_v36 = vpop.f32.mrf.mxu2  ;;  %v1280_v57 = vpop.f32.mrf.mxu3 }
 0x221   : > { %v862_v21 = vpop.f32.mrf.mxu1  ;;  %1260 = vmatmul.bf16.gmra.mxu2 %v1020_v15 }
 0x222   : > { %v863_v61 = vadd.f32 %v862_v21, %v2762_v25  ;;  %1338 = vmatmul.bf16.gmra.mxu0 %v1010_v5 }
 0x224   : > { %v893_v41 = vmul.f32 2.0, %v863_v61  ;;  %1309 = vmatmul.bf16.gmra.mxu3 %v1021_v10 }
 0x226   : > { %v928_v3 = vsub.f32 %v893_v41, %v2771_v34 }
 0x228   : > { %v1233_v1 = vpop.f32.mrf.mxu2  ;;  %v1282_v60 = vpop.f32.mrf.mxu3 }
 0x229   : > { %v864_v7 = vpop.f32.mrf.mxu1 }
 0x22a   : > { %v865_v9 = vadd.f32 %v864_v7, %v2764_v29 }
 0x22c   : > { %v894_v35 = vmul.f32 2.0, %v865_v9 }
 0x22e   : > { %v929_v11 = vsub.f32 %v894_v35, %v2774_v18  ;;  %v920_v18 = vld [vmem:[%s2744_s23 + $0x150] sm:$0xff]  ;;  %v2817_v35 = vld [vmem:[%s2899_s3] ss:$0 sm:$0xff] }
 0x22f   : > { %v1023_v39 = vpack.c.bf16 %v999_v22, %v920_v18  ;;  %v1234_v10 = vadd.f32 %v2817_v35, %v1233_v1 }
 0x230   : > { %v1013_v25 = vpack.c.bf16 %v929_v11, %v928_v3  ;;  %v1236_v3 = vpop.f32.mrf.mxu2 }
 0x231   : > { %v867_v8 = vpop.f32.mrf.mxu1  ;;  %1265 = vmatmul.bf16.gmra.mxu2 %v1023_v39 }
 0x232   : > { %v868_v12 = vadd.f32 %v867_v8, %v818_v13  ;;  %1343 = vmatmul.bf16.gmra.mxu0 %v1013_v25  ;;  %v1285_v13 = vpop.f32.mrf.mxu3 }
 0x234   : > { %v895_v29 = vmul.f32 2.0, %v868_v12  ;;  %1314 = vmatmul.bf16.gmra.mxu3 %v1024_v42  ;;  %v1283_v12 = vadd.f32 %v1282_v60, %v1234_v10 }
 0x236   : > { %v930_v33 = vsub.f32 %v895_v29, %v2781_v58 }
 0x239   : > { %v869_v19 = vpop.f32.mrf.mxu1 }
 0x23a   : > { %v870_v23 = vadd.f32 %v869_v19, %v820_v14  ;;  %v1287_v11 = vpop.f32.mrf.mxu3  ;;  %v1237_v14 = vadd.f32 %v2817_v35, %v1236_v3 }
 0x23c   : > { %v896_v34 = vmul.f32 2.0, %v870_v23  ;;  %v1286_v19 = vadd.f32 %v1285_v13, %v1237_v14 }
 0x23e   : > { %v931_v38 = vsub.f32 %v896_v34, %v2784_v59 }
 0x240   : > { %v1016_v31 = vpack.c.bf16 %v931_v38, %v930_v33 }
 0x241   : > { %v872_v43 = vpop.f32.mrf.mxu1 }
 0x242   : > { %v873_v47 = vadd.f32 %v872_v43, %v823_v26  ;;  %1348 = vmatmul.bf16.gmra.mxu0 %v1016_v31  ;;  %v1290_v8 = vpop.f32.mrf.mxu3 }
 0x244   : > { %v897_v50 = vmul.f32 2.0, %v873_v47 }
 0x246   : > { %v932_v51 = vsub.f32 %v897_v50, %v2793_v24 }
 0x249   : > { %v874_v55 = vpop.f32.mrf.mxu1 }
 0x24a   : > { %v875_v58 = vadd.f32 %v874_v55, %v825_v54  ;;  %v1292_v34 = vpop.f32.mrf.mxu3 }
 0x24c   : > { %v898_v59 = vmul.f32 2.0, %v875_v58 }
 0x24e   : > { %v933_v63 = vsub.f32 %v898_v59, %v987_v28 }
 0x250   : > { %v1019_v16 = vpack.c.bf16 %v933_v63, %v932_v51 }
 0x251   : > { %v877_v20 = vpop.f32.mrf.mxu1 }
 0x252   : > { %v878_v48 = vadd.f32 %v877_v20, %v828_v37  ;;  %1353 = vmatmul.bf16.gmra.mxu0 %v1019_v16  ;;  %v1295_v31 = vpop.f32.mrf.mxu3 }
 0x254   : > { %v899_v56 = vmul.f32 2.0, %v878_v48 }
 0x256   : > { %v934_v52 = vsub.f32 %v899_v56, %v918_v2  ;;  %v1238_v2 = vpop.f32.mrf.mxu2 }
 0x259   : > { %v879_v32 = vpop.f32.mrf.mxu1 }
 0x25a   : > { %v880_v40 = vadd.f32 %v879_v32, %v830_v46  ;;  %v1297_v51 = vpop.f32.mrf.mxu3 }
 0x25c   : > { %v900_v53 = vmul.f32 2.0, %v880_v40 }
 0x25e   : > { %v935_v45 = vsub.f32 %v900_v53, %v993_v6  ;;  %v1232_v6 = vadd.f32 %v2817_v35, %v1231_v36  ;;  %v1241_v25 = vpop.f32.mrf.mxu2 }
 0x25f   : > { %v1242_v27 = vadd.f32 %v2817_v35, %v1241_v25 }
 0x260   : > { %v1022_v24 = vpack.c.bf16 %v935_v45, %v934_v52  ;;  %v1281_v15 = vadd.f32 %v1280_v57, %v1232_v6 }
 0x261   : > { %v882_v49 = vpop.f32.mrf.mxu1  ;;  %v1291_v42 = vadd.f32 %v1290_v8, %v1242_v27 }
 0x262   : > { %v883_v17 = vadd.f32 %v882_v49, %v833_v62  ;;  %1358 = vmatmul.bf16.gmra.mxu0 %v1022_v24 }
 0x264   : > { %v901_v5 = vmul.f32 2.0, %v883_v17 }
 0x266   : > { %v936_v28 = vsub.f32 %v901_v5, %v920_v18  ;;  %v1243_v37 = vpop.f32.mrf.mxu2 }
 0x267   : > { %v1244_v50 = vadd.f32 %v2817_v35, %v1243_v37 }
 0x269   : > { %v884_v21 = vpop.f32.mrf.mxu1  ;;  %v1293_v54 = vadd.f32 %v1292_v34, %v1244_v50 }
 0x26a   : > { %v885_v61 = vadd.f32 %v884_v21, %v835_v44 }
 0x26c   : > { %v902_v41 = vmul.f32 2.0, %v885_v61 }
 0x26e   : > { %v937_v7 = vsub.f32 %v902_v41, %v999_v22  ;;  %v1239_v22 = vadd.f32 %v2817_v35, %v1238_v2  ;;  %v1246_v38 = vpop.f32.mrf.mxu2 }
 0x26f   : > { %v1247_v58 = vadd.f32 %v2817_v35, %v1246_v38 }
 0x270   : > { %v1025_v9 = vpack.c.bf16 %v937_v7, %v936_v28  ;;  %v1288_v39 = vadd.f32 %v1287_v11, %v1239_v22 }
 0x271   : > { %v1296_v63 = vadd.f32 %v1295_v31, %v1247_v58 }
 0x272   : > { %1363 = vmatmul.bf16.gmra.mxu0 %v1025_v9 }
 0x276   : > { %v1248_v46 = vpop.f32.mrf.mxu2 }
 0x277   : > { %v1249_v56 = vadd.f32 %v2817_v35, %v1248_v46 }
 0x279   : > { %v1298_v52 = vadd.f32 %v1297_v51, %v1249_v56 }
 0x27e   : > { %v1251_v59 = vpop.f32.mrf.mxu2 }
 0x27f   : > { %v1329_v0 = vpop.f32.mrf.mxu0  ;;  %v1252_v40 = vadd.f32 %v2817_v35, %v1251_v59 }
 0x280   : > { %v1330_v4 = vadd.f32 %v1329_v0, %v1281_v15 }
 0x282   : > { %1369 = vst [vmem:[%s2632_s18] sm:$0xff] %v1330_v4 }
 0x283   : > { %v1300_v16 = vpop.f32.mrf.mxu3 }
 0x284   : > { %v1301_v57 = vadd.f32 %v1300_v16, %v1252_v40 }
 0x286   : > { %v1253_v44 = vpop.f32.mrf.mxu2 }
 0x287   : > { %v1331_v29 = vpop.f32.mrf.mxu0  ;;  %v1254_v1 = vadd.f32 %v2817_v35, %v1253_v44 }
 0x288   : > { %v1332_v33 = vadd.f32 %v1331_v29, %v1283_v12 }
 0x28a   : > { %1370 = vst [vmem:[%s2632_s18 + $0x8] sm:$0xff] %v1332_v33 }
 0x28b   : > { %v1302_v36 = vpop.f32.mrf.mxu3 }
 0x28c   : > { %v1303_v5 = vadd.f32 %v1302_v36, %v1254_v1 }
 0x28e   : > { %v1256_v45 = vpop.f32.mrf.mxu2 }
 0x28f   : > { %v1334_v23 = vpop.f32.mrf.mxu0  ;;  %v1257_v21 = vadd.f32 %v2817_v35, %v1256_v45 }
 0x290   : > { %v1335_v18 = vadd.f32 %v1334_v23, %v1286_v19 }
 0x292   : > { %1371 = vst [vmem:[%s2632_s18 + $0x10] sm:$0xff] %v1335_v18 }
 0x296   : > { %v1258_v60 = vpop.f32.mrf.mxu2 }
 0x297   : > { %v1336_v26 = vpop.f32.mrf.mxu0  ;;  %v1305_v17 = vpop.f32.mrf.mxu3  ;;  %v1259_v2 = vadd.f32 %v2817_v35, %v1258_v60 }
 0x298   : > { %v1337_v30 = vadd.f32 %v1336_v26, %v1288_v39  ;;  %v1306_v3 = vadd.f32 %v1305_v17, %v1257_v21 }
 0x29a   : > { %1372 = vst [vmem:[%s2632_s18 + $0x18] sm:$0xff] %v1337_v30 }
 0x29f   : > { %v1339_v43 = vpop.f32.mrf.mxu0  ;;  %v1307_v41 = vpop.f32.mrf.mxu3 }
 0x2a0   : > { %v1340_v47 = vadd.f32 %v1339_v43, %v1291_v42  ;;  %v1308_v11 = vadd.f32 %v1307_v41, %v1259_v2 }
 0x2a2   : > { %1373 = vst [vmem:[%s2632_s18 + $0x20] sm:$0xff] %v1340_v47 }
 0x2a4   : > { %v1261_v13 = vpop.f32.mrf.mxu2 }
 0x2a5   : > { %v1262_v0 = vadd.f32 %v2817_v35, %v1261_v13 }
 0x2a7   : > { %v1341_v55 = vpop.f32.mrf.mxu0  ;;  %v1310_v6 = vpop.f32.mrf.mxu3 }
 0x2a8   : > { %v1342_v62 = vadd.f32 %v1341_v55, %v1293_v54  ;;  %v1311_v10 = vadd.f32 %v1310_v6, %v1262_v0 }
 0x2aa   : > { %1374 = vst [vmem:[%s2632_s18 + $0x28] sm:$0xff] %v1342_v62 }
 0x2ac   : > { %v1263_v25 = vpop.f32.mrf.mxu2 }
 0x2ad   : > { %v1264_v14 = vadd.f32 %v2817_v35, %v1263_v25 }
 0x2af   : > { %v1344_v20 = vpop.f32.mrf.mxu0  ;;  %v1312_v8 = vpop.f32.mrf.mxu3 }
 0x2b0   : > { %v1345_v48 = vadd.f32 %v1344_v20, %v1296_v63  ;;  %v1313_v37 = vadd.f32 %v1312_v8, %v1264_v14 }
 0x2b2   : > { %1375 = vst [vmem:[%s2632_s18 + $0x30] sm:$0xff] %v1345_v48 }
 0x2b4   : > { %v1266_v33 = vpop.f32.mrf.mxu2 }
 0x2b5   : > { %v1267_v23 = vadd.f32 %v2817_v35, %v1266_v33 }
 0x2b7   : > { %v1346_v32 = vpop.f32.mrf.mxu0  ;;  %v1315_v18 = vpop.f32.mrf.mxu3 }
 0x2b8   : > { %v1347_v53 = vadd.f32 %v1346_v32, %v1298_v52  ;;  %v1316_v22 = vadd.f32 %v1315_v18, %v1267_v23 }
 0x2ba   : > { %1376 = vst [vmem:[%s2632_s18 + $0x38] sm:$0xff] %v1347_v53 }
 0x2bc   : > { %v1268_v38 = vpop.f32.mrf.mxu2 }
 0x2bd   : > { %v1269_v27 = vadd.f32 %v2817_v35, %v1268_v38 }
 0x2bf   : > { %v1349_v24 = vpop.f32.mrf.mxu0  ;;  %v1317_v30 = vpop.f32.mrf.mxu3 }
 0x2c0   : > { %v1350_v49 = vadd.f32 %v1349_v24, %v1301_v57  ;;  %v1318_v31 = vadd.f32 %v1317_v30, %v1269_v27 }
 0x2c2   : > { %1377 = vst [vmem:[%s2632_s18 + $0x40] sm:$0xff] %v1350_v49 }
 0x2c7   : > { %v1351_v28 = vpop.f32.mrf.mxu0 }
 0x2c8   : > { %v1352_v61 = vadd.f32 %v1351_v28, %v1303_v5 }
 0x2ca   : > { %1378 = vst [vmem:[%s2632_s18 + $0x48] sm:$0xff] %v1352_v61 }
 0x2cf   : > { %v1354_v7 = vpop.f32.mrf.mxu0 }
 0x2d0   : > { %v1355_v9 = vadd.f32 %v1354_v7, %v1306_v3 }
 0x2d2   : > { %1379 = vst [vmem:[%s2632_s18 + $0x50] sm:$0xff] %v1355_v9 }
 0x2d7   : > { %v1356_v15 = vpop.f32.mrf.mxu0 }
 0x2d8   : > { %v1357_v4 = vadd.f32 %v1356_v15, %v1308_v11 }
 0x2da   : > { %1380 = vst [vmem:[%s2632_s18 + $0x58] sm:$0xff] %v1357_v4 }
 0x2df   : > { %v1359_v12 = vpop.f32.mrf.mxu0 }
 0x2e0   : > { %v1360_v29 = vadd.f32 %v1359_v12, %v1311_v10 }
 0x2e2   : > { %1381 = vst [vmem:[%s2632_s18 + $0x60] sm:$0xff] %v1360_v29 }
 0x2e7   : > { %v1361_v19 = vpop.f32.mrf.mxu0 }
 0x2e8   : > { %v1362_v34 = vadd.f32 %v1361_v19, %v1313_v37 }
 0x2ea   : > { %1382 = vst [vmem:[%s2632_s18 + $0x68] sm:$0xff] %v1362_v34 }
 0x2ef   : > { %v1364_v39 = vpop.f32.mrf.mxu0 }
 0x2f0   : > { %v1365_v26 = vadd.f32 %v1364_v39, %v1316_v22 }
 0x2f2   : > { %1383 = vst [vmem:[%s2632_s18 + $0x70] sm:$0xff] %v1365_v26 }
 0x2f7   : > { %v1366_v42 = vpop.f32.mrf.mxu0 }
 0x2f8   : > { %v1367_v43 = vadd.f32 %v1366_v42, %v1318_v31 }
 0x2fa   : > { %1384 = vst [vmem:[%s2632_s18 + $0x78] sm:$0xff] %v1367_v43 }
 0x2fb PF: > { %s1397_s9 = scalar_lea.hbm %s2900_s4, %s2427_s20  ;;  %s1398_s11 = sshll.u32 %s2632_s18, 4  ;;  %s1399_s11 = int_to_ptr.vmem [resolvable:$true] %s1398_s11 }
 0x2fc   : > { %s1400_s10 = sshll.u32 %s1397_s9, 4  ;;  %s1386_s21 = scalar_lea.sflag [#allocation7], %s235_s1  ;;  %s1401_s10 = int_to_ptr.hbm [resolvable:$true] %s1400_s10 }
 0x2fd   : > { %s2191_s25 = sshra.s32 %s1401_s10, 4  ;;  %s2197_s12 = scalar_lea.hbm %s2900_s4, 256  ;;  %s2192_s25 = int_to_ptr.hbm [resolvable:$true] %s2191_s25 }
 0x2fe   : > { %s2193_s26 = scalar_lea.hbm %s2192_s25, 128  ;;  %p2198_p7 = scmp.lt.s32.totalorder %s2192_s25, %s2900_s4 }
 0x2ff   : > { %p2194_p4 = scmp.ne.s32.totalorder %s2192_s25, %s2193_s26  ;;  %p2199_p9 = scmp.lt.s32.totalorder %s2197_s12, %s2193_s26 }
 0x301   : > { %p2195_p5 = pnand %p2194_p4, %p2367_p3  ;;  %p2200_p10 = por %p2199_p9, %p2198_p7 }
 0x303   : > { %p2196_p6 = pneg %p2195_p5 }
 0x305   : > { %p2201_p11 = pnand %p2200_p10, %p2196_p6 }
 0x307   : > { %2204 = shalt.err (!%p2201_p11)
}
 0x308   : > { %s2288_s1 = smov 128   ;;  %s2289_s20 = smov 8  }
 0x309   : > { %1990 = dma.vmem_to_hbm [thread:$0]  (%p2367_p3), %s1399_s11, 2048, %s1401_s10, %s1386_s21, %s2288_s1, %s2288_s1, %s2289_s20  }
 0x30a PF: > { %p2012_p12 = scmp.ge.s32.totalorder %s2279_s22, 2  ;;  %s1415_s18 = sand.u32 1, %s2251_s15  }
 0x30b   : > { %s1416_s19 = scalar_lea.sflag [#allocation7], %s1415_s18 }
 0x30c   : > { %p2003_p13 = pnand %p2012_p12, %p2378_p8 }
 0x30e   : > { %p2004_p0 = pneg %p2003_p13 }
 0x310   : > { %2246 = dma.done.wait (%p2004_p0), %s1416_s19, 2048  }
 0x311   : > { %2248 = vsyncadd (%p2004_p0), %s1416_s19, 4294965248  ;;  %s19_s22 = sadd.s32 1, %s2279_s22   ;;  %s2951_s18 = sld [smem:[#allocation15_spill]] }
 0x312   : > { %p16_p1 = scmp.ge.s32.totalorder %s19_s22, 6   ;;  %s2952_s19 = sld [smem:[#allocation16_spill]] }
 0x313   : > { %s2953_s20 = sld [smem:[#allocation17_spill]]  ;;  %s2955_s15 = smov %s2255_s16 }
 0x314   : > { %s2954_s21 = sld [smem:[#allocation18_spill]]  ;;  %s2956_s16 = smov %s2259_s17 }
 0x315   : > { %s2957_s17 = smov %s2376_s30  ;;  %18 = sbr.rel (!%p16_p1) target bundleno = 9 (0x9), region = 94 }
 0x31a   :  { %1422 = vsyncpa [#allocation6], 1 }
 0x31b   :  { %1424 = vsyncpa [#allocation6 + $0x1], 1 }
 0x31c   :  { %1425 = vsyncpa [#allocation9], 1 }
 0x31d   :  { %1426 = vsyncpa [#allocation7], 1 }
 0x31e   :  { %1428 = vsyncpa [#allocation7 + $0x1], 1 }

</bundles_post_ra>
